<compile_context>
chip_gen: v7x
topology: tpu7x:2x2x1
jax: 0.10.0
libtpu: 0.0.40
codegen_flags: <defaults>
</compile_context>

<pallas_src>
import functools

import numpy as np
import jax
import jax.numpy as jnp
from jax import lax
from jax.experimental import pallas as pl
from jax.experimental.pallas import tpu as pltpu


_VMEM = pl.BlockSpec(memory_space=pltpu.MemorySpace.VMEM)
ALIGN = 512   # graph / feature row & col padding (keeps tiles large)


# ----------------------------------------------------------------------------
# helpers
# ----------------------------------------------------------------------------
def _round_up(n, m):
    return ((n + m - 1) // m) * m


def _choose_tile(n_pad, target):
    """Largest multiple of 128 <= min(target, n_pad) that divides n_pad."""
    t = min(target, n_pad)
    t = max(128, (t // 128) * 128)
    while n_pad % t != 0:
        t -= 128
    return t


def _choose_row_tile(n_pad, target):
    """Row tile; prefer >=2 row tiles (megacore sharding) when cheap."""
    t = _choose_tile(n_pad, target)
    if t == n_pad and n_pad >= 256:
        t2 = _choose_tile(n_pad, n_pad // 2)
        if t2 >= 256:
            t = t2
    return t


_VMEM_LIMIT_CACHE = [None]


def _vmem_limit(override=None):
    """~96 MiB on 128-MiB VMEM chips (v5e/v6e), 48 MiB on v7x (64 MiB)."""
    if override is not None:
        return override
    if _VMEM_LIMIT_CACHE[0] is None:
        try:
            cap = int(pltpu.get_tpu_info().vmem_capacity_bytes)
        except Exception:
            cap = 64 << 20
        _VMEM_LIMIT_CACHE[0] = (96 << 20) if cap >= (128 << 20) else (48 << 20)
    return _VMEM_LIMIT_CACHE[0]


def _take_rows(x, start, count, pad_to):
    """Rows [start, start+count) of x as a (pad_to, D) array.

    Fast path (start == 0): aligned leading slice; rows beyond `count` may
    hold other nodes' data — harmless because they are never gathered and the
    corresponding aggregation-graph columns are zero.
    """
    if start == 0 and x.shape[0] >= pad_to:
        return lax.slice_in_dim(x, 0, pad_to, axis=0)
    sl = lax.slice_in_dim(x, start, start + count, axis=0)
    if pad_to > count:
        sl = jnp.pad(sl, ((0, pad_to - count), (0, 0)))
    return sl


# ----------------------------------------------------------------------------
# Pallas kernels
# ----------------------------------------------------------------------------
def _prop_layer_kernel(g_ref, f_ref, accin_ref, fout_ref, accout_ref, mm_ref,
                       *, coef_prev, coef_layer):
    """One LightGCN layer tile: mm += G_blk @ F_blk (bf16 x bf16 -> f32).
    At last k: fout = bf16(mm) for the next layer,
               accout = coef_prev * accin + coef_layer * l2norm(mm)."""
    k = pl.program_id(1)

    @pl.when(k == 0)
    def _():
        mm_ref[...] = jnp.zeros_like(mm_ref)

    mm_ref[...] += jnp.dot(g_ref[...], f_ref[...],
                           preferred_element_type=jnp.float32)

    @pl.when(k == pl.num_programs(1) - 1)
    def _():
        f_new = mm_ref[...]                              # f32 (tm, d_pad)
        fout_ref[...] = f_new.astype(jnp.bfloat16)       # next layer operand
        sumsq = jnp.sum(f_new * f_new, axis=1, keepdims=True)
        fn = f_new * lax.rsqrt(jnp.maximum(sumsq, 1e-24))   # F.normalize p=2
        accout_ref[...] = coef_prev * accin_ref[...] + coef_layer * fn


def _agg_kernel(g_ref, f_ref, o_ref):
    """Tiled agg_graph @ item_features, accumulating directly into the
    VMEM-resident f32 output block (same block index across k)."""
    @pl.when(pl.program_id(1) == 0)
    def _():
        o_ref[...] = jnp.zeros_like(o_ref)

    o_ref[...] += jnp.dot(g_ref[...], f_ref[...],
                          preferred_element_type=jnp.float32)


def _fuse_kernel(a_ref, b_ref, c_ref, o_ref, *, w0, w1, w2):
    o_ref[...] = w0 * a_ref[...] + w1 * b_ref[...] + w2 * c_ref[...]


def _loss_kernel(u_ref, b_ref, bpr_ref, closs_ref, *, c_temp):
    u = u_ref[...]                          # (B, 1, D) fused user reps
    b = b_ref[...]                          # (B, nb, D) fused bundle reps
    B, nb, _ = b.shape
    inv_temp = 1.0 / c_temp

    # ---- BPR loss: mean softplus(-(pos - neg)), numerically stable ---------
    ub = jnp.broadcast_to(u, b.shape)       # VMEM-local broadcast (no HBM copy)
    pred = jnp.sum(ub * b, axis=2)          # (B, nb)
    diff = pred[:, :1] - pred[:, 1:]        # (B, nb-1)
    sp = jnp.maximum(-diff, 0.0) + jnp.log(1.0 + jnp.exp(-jnp.abs(diff)))
    s = jnp.sum(jnp.sum(sp, axis=1, keepdims=True), axis=0, keepdims=True)
    bpr_ref[...] = s * (1.0 / float(B * (nb - 1)))

    # ---- Contrastive loss (self-view, as in reference cal_loss) ------------
    def c_loss(x0):                                             # x0: (B, D)
        sumsq = jnp.sum(x0 * x0, axis=1, keepdims=True)
        xn = x0 * lax.rsqrt(jnp.maximum(sumsq, 1e-24))
        pos = jnp.sum(xn * xn, axis=1, keepdims=True)           # == 1 self-view
        ttl = lax.dot_general(xn, xn, (((1,), (1,)), ((), ())),
                              preferred_element_type=jnp.float32)   # (B, B)
        logits = ttl * inv_temp
        m = jnp.max(logits, axis=1, keepdims=True)
        lse = m + jnp.log(jnp.sum(jnp.exp(logits - m), axis=1, keepdims=True))
        lg = pos * inv_temp - lse                               # (B, 1)
        return -jnp.sum(lg, axis=0, keepdims=True) * (1.0 / float(B))

    closs_ref[...] = (c_loss(u[:, 0, :]) + c_loss(b[:, 0, :])) * 0.5


# ----------------------------------------------------------------------------
# pallas_call wrappers
# ----------------------------------------------------------------------------
def propagate(graph_pad_bf16, feats, layer_coefs, num_layers,
              *, tile_m=4096, tile_k=512, vmem_limit=None):
    """Multi-layer LightGCN propagation + layer-coefficient sum.
    graph_pad_bf16: (N_pad, N_pad) bf16 padded normalized adjacency.
    feats: (N, D) f32 un-padded embeddings.  Returns (N_pad, D_pad) f32."""
    n_pad = graph_pad_bf16.shape[0]
    n, d = feats.shape
    d_pad = _round_up(d, 128)
    f32 = jnp.pad(feats.astype(jnp.float32), ((0, n_pad - n), (0, d_pad - d)))

    if num_layers == 0:
        return float(layer_coefs[0]) * f32

    vmem_limit = _vmem_limit(vmem_limit)
    tm = _choose_row_tile(n_pad, tile_m)
    tk = _choose_tile(n_pad, tile_k)
    grid = (n_pad // tm, n_pad // tk)

    f_bf = f32.astype(jnp.bfloat16)   # bf16 MXU operand for layer 1
    acc = f32                         # layer-0 term carried via coef_prev
    for l in range(1, num_layers + 1):
        coef_prev = float(layer_coefs[0]) if l == 1 else 1.0
        kernel = functools.partial(_prop_layer_kernel,
                                   coef_prev=coef_prev,
                                   coef_layer=float(layer_coefs[l]))
        f_bf, acc = pl.pallas_call(
            kernel,
            out_shape=(jax.ShapeDtypeStruct((n_pad, d_pad), jnp.bfloat16),
                       jax.ShapeDtypeStruct((n_pad, d_pad), jnp.float32)),
            grid=grid,
            in_specs=[pl.BlockSpec((tm, tk), lambda i, k: (i, k)),
                      pl.BlockSpec((tk, d_pad), lambda i, k: (k, 0)),
                      pl.BlockSpec((tm, d_pad), lambda i, k: (i, 0))],
            out_specs=(pl.BlockSpec((tm, d_pad), lambda i, k: (i, 0)),
                       pl.BlockSpec((tm, d_pad), lambda i, k: (i, 0))),
            scratch_shapes=[pltpu.VMEM((tm, d_pad), jnp.float32)],
            compiler_params=pltpu.CompilerParams(
                dimension_semantics=("parallel", "arbitrary"),
                vmem_limit_bytes=vmem_limit),
        )(graph_pad_bf16, f_bf, acc)
    return acc


def aggregate(agg_pad_bf16, feats_f32, *, tile_m=4096, tile_k=512,
              vmem_limit=None):
    """agg_graph @ feats.  agg_pad_bf16: (M_pad, K_pad) bf16;
    feats_f32: (K_rows, D_pad) f32 with K_rows <= K_pad (extra graph columns
    are zero).  Returns (M_pad, D_pad) f32."""
    m_pad, k_pad = agg_pad_bf16.shape
    kk, d_pad = feats_f32.shape
    f_bf = feats_f32.astype(jnp.bfloat16)
    if k_pad > kk:
        f_bf = jnp.pad(f_bf, ((0, k_pad - kk), (0, 0)))

    vmem_limit = _vmem_limit(vmem_limit)
    tm = _choose_row_tile(m_pad, tile_m)
    tk = _choose_tile(k_pad, tile_k)
    grid = (m_pad // tm, k_pad // tk)

    return pl.pallas_call(
        _agg_kernel,
        out_shape=jax.ShapeDtypeStruct((m_pad, d_pad), jnp.float32),
        grid=grid,
        in_specs=[pl.BlockSpec((tm, tk), lambda i, k: (i, k)),
                  pl.BlockSpec((tk, d_pad), lambda i, k: (k, 0))],
        out_specs=pl.BlockSpec((tm, d_pad), lambda i, k: (i, 0)),
        compiler_params=pltpu.CompilerParams(
            dimension_semantics=("parallel", "arbitrary"),
            vmem_limit_bytes=vmem_limit),
    )(agg_pad_bf16, f_bf)


def fuse(modal_weights, a, b, c, *, tile=2048, vmem_limit=None):
    """Row-tiled modal-weighted sum of three identically padded (N_pad, D_pad)
    f32 views — no padding/slicing inside this stage."""
    assert a.shape == b.shape == c.shape
    n_pad, d_pad = a.shape
    vmem_limit = _vmem_limit(vmem_limit)
    tm = _choose_tile(n_pad, tile)
    grid = (n_pad // tm,)

    kernel = functools.partial(_fuse_kernel,
                               w0=float(modal_weights[0]),
                               w1=float(modal_weights[1]),
                               w2=float(modal_weights[2]))
    return pl.pallas_call(
        kernel,
        out_shape=jax.ShapeDtypeStruct((n_pad, d_pad), jnp.float32),
        grid=grid,
        in_specs=[pl.BlockSpec((tm, d_pad), lambda i: (i, 0))] * 3,
        out_specs=pl.BlockSpec((tm, d_pad), lambda i: (i, 0)),
        compiler_params=pltpu.CompilerParams(
            dimension_semantics=("parallel",),
            vmem_limit_bytes=vmem_limit),
    )(a, b, c)


def cal_losses(users_emb, bundles_emb, c_temp):
    """users_emb: (B, 1, D_pad); bundles_emb: (B, nb, D_pad)."""
    bpr, closs = pl.pallas_call(
        functools.partial(_loss_kernel, c_temp=float(c_temp)),
        out_shape=(jax.ShapeDtypeStruct((1, 1), jnp.float32),
                   jax.ShapeDtypeStruct((1, 1), jnp.float32)),
        in_specs=[_VMEM, _VMEM],
        out_specs=(_VMEM, _VMEM),
    )(users_emb.astype(jnp.float32), bundles_emb.astype(jnp.float32))
    return bpr[0, 0], closs[0, 0]


# ----------------------------------------------------------------------------
# Glue: graph construction (numpy, deterministic) & parameter init
# ----------------------------------------------------------------------------
def laplace_transform_dense(G):
    rs = G.sum(axis=1)
    cs = G.sum(axis=0)
    dr = 1.0 / (np.sqrt(rs) + 1e-8)
    dc = 1.0 / (np.sqrt(cs) + 1e-8)
    return ((dr[:, None] * G) * dc[None, :]).astype(np.float32)


def propagation_graph(bip):
    n0, n1 = bip.shape
    top = np.concatenate([np.zeros((n0, n0), np.float32), bip], axis=1)
    bot = np.concatenate([bip.T, np.zeros((n1, n1), np.float32)], axis=1)
    G = np.concatenate([top, bot], axis=0)
    return laplace_transform_dense(G)


def aggregation_graph(bip):
    bs = bip.sum(axis=1) + 1e-8
    return ((1.0 / bs)[:, None] * bip).astype(np.float32)


def _pad_graph_bf16(G, align=ALIGN):
    r, c = G.shape
    rp, cp = _round_up(r, align), _round_up(c, align)
    Gp = np.pad(G, ((0, rp - r), (0, cp - c)))
    return jnp.asarray(Gp).astype(jnp.bfloat16)


def xavier_normal(key, shape):
    fan_in, fan_out = shape[0], shape[1]
    std = float(np.sqrt(2.0 / (fan_in + fan_out)))
    return jax.random.normal(key, shape, dtype=jnp.float32) * std


# ----------------------------------------------------------------------------
# MultiCBR forward (training path: test=False, aug ratios = 0 -> deterministic)
# ----------------------------------------------------------------------------
def multicbr_forward(params, graphs, fusion, users, bundles, num_layers, c_temp,
                     num_users, num_bundles, num_items):
    uf, bf, itf = params["users"], params["bundles"], params["items"]
    U_pad = _round_up(num_users, ALIGN)
    B_pad = _round_up(num_bundles, ALIGN)
    I_pad = _round_up(num_items, ALIGN)

    # UB view
    ub_acc = propagate(graphs["UB_prop"], jnp.concatenate([uf, bf], axis=0),
                       fusion["UB_layer"], num_layers)
    UB_u = _take_rows(ub_acc, 0, num_users, U_pad)
    UB_b = _take_rows(ub_acc, num_users, num_bundles, B_pad)

    # UI view
    ui_acc = propagate(graphs["UI_prop"], jnp.concatenate([uf, itf], axis=0),
                       fusion["UI_layer"], num_layers)
    UI_u = _take_rows(ui_acc, 0, num_users, U_pad)
    UI_i = _take_rows(ui_acc, num_users, num_items, I_pad)
    UI_b = aggregate(graphs["BI_agg"], UI_i)            # (B_pad, D_pad)

    # BI view
    bi_acc = propagate(graphs["BI_prop"], jnp.concatenate([bf, itf], axis=0),
                       fusion["BI_layer"], num_layers)
    BI_b = _take_rows(bi_acc, 0, num_bundles, B_pad)
    BI_i = _take_rows(bi_acc, num_bundles, num_items, I_pad)
    BI_u = aggregate(graphs["UI_agg"], BI_i)            # (U_pad, D_pad)

    users_rep = fuse(fusion["modal"], UB_u, UI_u, BI_u)       # (U_pad, D_pad)
    bundles_rep = fuse(fusion["modal"], UB_b, UI_b, BI_b)     # (B_pad, D_pad)

    # final gather only at logical indices (padded rows never touched)
    users_emb = users_rep[users]                              # (B, 1, D_pad)
    bundles_emb = bundles_rep[bundles]                        # (B, nb, D_pad)

    return cal_losses(users_emb, bundles_emb, c_temp)


# ----------------------------------------------------------------------------
if __name__ == "__main__":
    # small, module-consistent config
    num_users, num_bundles, num_items = 24, 16, 40
    embedding_size = 32
    num_layers = 2
    c_temp = 0.2
    batch_size, n_per_user = 8, 2   # (pos, neg) bundles per user

    key = jax.random.PRNGKey(0)
    k_u, k_b, k_i, k_ub, k_ui, k_bi, k_users, k_bundles = jax.random.split(key, 8)

    # parameters (xavier_normal_ init, deterministic)
    params = {
        "users":   xavier_normal(k_u, (num_users, embedding_size)),
        "bundles": xavier_normal(k_b, (num_bundles, embedding_size)),
        "items":   xavier_normal(k_i, (num_items, embedding_size)),
    }

    # deterministic bipartite interaction graphs (dense 0/1)
    ub = np.array(jax.random.bernoulli(k_ub, 0.3, (num_users, num_bundles)),
                  dtype=np.float32)
    ui = np.array(jax.random.bernoulli(k_ui, 0.3, (num_users, num_items)),
                  dtype=np.float32)
    bi = np.array(jax.random.bernoulli(k_bi, 0.3, (num_bundles, num_items)),
                  dtype=np.float32)

    graphs = {
        "UB_prop": _pad_graph_bf16(propagation_graph(ub)),
        "UI_prop": _pad_graph_bf16(propagation_graph(ui)),
        "BI_prop": _pad_graph_bf16(propagation_graph(bi)),
        "UI_agg":  _pad_graph_bf16(aggregation_graph(ui)),
        "BI_agg":  _pad_graph_bf16(aggregation_graph(bi)),
    }

    # fusion weights are static config constants (baked into kernels)
    fusion = {
        "modal":    [0.5, 0.3, 0.2],
        "UB_layer": [1 / 3, 1 / 3, 1 / 3],
        "UI_layer": [0.4, 0.3, 0.3],
        "BI_layer": [0.5, 0.25, 0.25],
    }

    users = jax.random.randint(k_users, (batch_size, 1), 0, num_users,
                               dtype=jnp.int32)
    bundles = jax.random.randint(k_bundles, (batch_size, n_per_user), 0,
                                 num_bundles, dtype=jnp.int32)

    bpr_loss, c_loss = multicbr_forward(
        params, graphs, fusion, users, bundles, num_layers, c_temp,
        num_users, num_bundles, num_items)

    bpr_loss = jax.block_until_ready(bpr_loss)
    c_loss = jax.block_until_ready(c_loss)

    assert np.isfinite(float(bpr_loss)) and np.isfinite(float(c_loss))
    print("KERNEL_OK")
</pallas_src>

<mosaic_0001>
module attributes {stable_mosaic.version = 11 : i64} {
  func.func @_prop_layer_kernel(%arg0: i32, %arg1: i32, %arg2: memref<256x512xbf16, #tpu.memory_space<vmem>>, %arg3: memref<512x128xbf16, #tpu.memory_space<vmem>>, %arg4: memref<256x128xf32, #tpu.memory_space<vmem>>, %arg5: memref<256x128xbf16, #tpu.memory_space<vmem>>, %arg6: memref<256x128xf32, #tpu.memory_space<vmem>>, %arg7: memref<256x128xf32, #tpu.memory_space<vmem>>) attributes {dimension_semantics = [#tpu.dimension_semantics<parallel>, #tpu.dimension_semantics<arbitrary>], iteration_bounds = array<i64: 2, 1>, scalar_prefetch = 0 : i64, scratch_operands = 1 : i64, tpu.core_type = #tpu.core_type<tc>, window_params = [{transform_indices = @transform_0, window_bounds = array<i64: 256, 512>}, {transform_indices = @transform_1, window_bounds = array<i64: 512, 128>}, {transform_indices = @transform_2, window_bounds = array<i64: 256, 128>}, {transform_indices = @transform_3, window_bounds = array<i64: 256, 128>}, {transform_indices = @transform_4, window_bounds = array<i64: 256, 128>}]} {
    %c0_i32 = arith.constant 0 : i32
    %0 = arith.cmpi eq, %arg1, %c0_i32 : i32
    %1 = arith.extui %0 : i1 to i32
    %c0_i32_0 = arith.constant 0 : i32
    %2 = arith.cmpi ne, %1, %c0_i32_0 : i32
    scf.if %2 {
      %cst_10 = arith.constant 0.000000e+00 : f32
      %12 = vector.broadcast %cst_10 : f32 to vector<256x128xf32>
      %c0_11 = arith.constant 0 : index
      %c0_12 = arith.constant 0 : index
      %13 = vector.load %arg7[%c0_11, %c0_12] : memref<256x128xf32, #tpu.memory_space<vmem>>, vector<256x128xf32>
      tpu.vector_store %arg7[%c0_11, %c0_12], %12 {strides = array<i32>} : memref<256x128xf32, #tpu.memory_space<vmem>>, vector<256x128xf32>,
    } else {
    }
    %c0 = arith.constant 0 : index
    %c0_1 = arith.constant 0 : index
    %3 = vector.load %arg7[%c0, %c0_1] : memref<256x128xf32, #tpu.memory_space<vmem>>, vector<256x128xf32>
    %c0_2 = arith.constant 0 : index
    %c0_3 = arith.constant 0 : index
    %4 = vector.load %arg2[%c0_2, %c0_3] : memref<256x512xbf16, #tpu.memory_space<vmem>>, vector<256x512xbf16>
    %c0_4 = arith.constant 0 : index
    %c0_5 = arith.constant 0 : index
    %5 = vector.load %arg3[%c0_4, %c0_5] : memref<512x128xbf16, #tpu.memory_space<vmem>>, vector<512x128xbf16>
    %cst = arith.constant dense<0.000000e+00> : vector<256x128xf32>
    %6 = tpu.matmul %4, %5, %cst {dimension_numbers = #tpu.dot_dimension_numbers<[1], [0], [0], [1], [0, 0, 1, 1], [], []>} : vector<256x512xbf16>, vector<512x128xbf16>, vector<256x128xf32> -> vector<256x128xf32>
    %7 = arith.addf %3, %6 : vector<256x128xf32>
    %c0_6 = arith.constant 0 : index
    %c0_7 = arith.constant 0 : index
    %8 = vector.load %arg7[%c0_6, %c0_7] : memref<256x128xf32, #tpu.memory_space<vmem>>, vector<256x128xf32>
    tpu.vector_store %arg7[%c0_6, %c0_7], %7 {strides = array<i32>} : memref<256x128xf32, #tpu.memory_space<vmem>>, vector<256x128xf32>,
    %c0_i32_8 = arith.constant 0 : i32
    %9 = arith.cmpi eq, %arg1, %c0_i32_8 : i32
    %10 = arith.extui %9 : i1 to i32
    %c0_i32_9 = arith.constant 0 : i32
    %11 = arith.cmpi ne, %10, %c0_i32_9 : i32
    scf.if %11 {
      %c0_10 = arith.constant 0 : index
      %c0_11 = arith.constant 0 : index
      %12 = vector.load %arg7[%c0_10, %c0_11] : memref<256x128xf32, #tpu.memory_space<vmem>>, vector<256x128xf32>
      %13 = arith.truncf %12 : vector<256x128xf32> to vector<256x128xbf16>
      %c0_12 = arith.constant 0 : index
      %c0_13 = arith.constant 0 : index
      %14 = vector.load %arg5[%c0_12, %c0_13] : memref<256x128xbf16, #tpu.memory_space<vmem>>, vector<256x128xbf16>
      tpu.vector_store %arg5[%c0_12, %c0_13], %13 {strides = array<i32>} : memref<256x128xbf16, #tpu.memory_space<vmem>>, vector<256x128xbf16>,
      %15 = arith.mulf %12, %12 : vector<256x128xf32>
      %cst_14 = arith.constant dense<0.000000e+00> : vector<256xf32>
      %16 = vector.multi_reduction <add>, %15, %cst_14 [1] : vector<256x128xf32> to vector<256xf32>
      %17 = vector.shape_cast %16 : vector<256xf32> to vector<256x1xf32>
      %cst_15 = arith.constant 1.000000e-24 : f32
      %18 = vector.broadcast %cst_15 : f32 to vector<256x1xf32>
      %19 = arith.maximumf %17, %18 : vector<256x1xf32>
      %20 = math.rsqrt %19 : vector<256x1xf32>
      %21 = vector.broadcast %20 : vector<256x1xf32> to vector<256x128xf32>
      %22 = arith.mulf %12, %21 : vector<256x128xf32>
      %c0_16 = arith.constant 0 : index
      %c0_17 = arith.constant 0 : index
      %23 = vector.load %arg4[%c0_16, %c0_17] : memref<256x128xf32, #tpu.memory_space<vmem>>, vector<256x128xf32>
      %cst_18 = arith.constant 0.333333343 : f32
      %24 = vector.broadcast %cst_18 : f32 to vector<256x128xf32>
      %25 = arith.mulf %24, %23 : vector<256x128xf32>
      %cst_19 = arith.constant 0.333333343 : f32
      %26 = vector.broadcast %cst_19 : f32 to vector<256x128xf32>
      %27 = arith.mulf %26, %22 : vector<256x128xf32>
      %28 = arith.addf %25, %27 : vector<256x128xf32>
      %c0_20 = arith.constant 0 : index
      %c0_21 = arith.constant 0 : index
      %29 = vector.load %arg6[%c0_20, %c0_21] : memref<256x128xf32, #tpu.memory_space<vmem>>, vector<256x128xf32>
      tpu.vector_store %arg6[%c0_20, %c0_21], %28 {strides = array<i32>} : memref<256x128xf32, #tpu.memory_space<vmem>>, vector<256x128xf32>,
    } else {
    }
    return
  }
  func.func @transform_0(%arg0: i32, %arg1: i32) -> (i32, i32) {
    %c0_i32 = arith.constant 0 : i32
    return %arg0, %arg1 : i32, i32
  }
  func.func @transform_1(%arg0: i32, %arg1: i32) -> (i32, i32) {
    %c0_i32 = arith.constant 0 : i32
    %c0_i32_0 = arith.constant 0 : i32
    return %arg1, %c0_i32 : i32, i32
  }
  func.func @transform_2(%arg0: i32, %arg1: i32) -> (i32, i32) {
    %c0_i32 = arith.constant 0 : i32
    %c0_i32_0 = arith.constant 0 : i32
    return %arg0, %c0_i32 : i32, i32
  }
  func.func @transform_3(%arg0: i32, %arg1: i32) -> (i32, i32) {
    %c0_i32 = arith.constant 0 : i32
    %c0_i32_0 = arith.constant 0 : i32
    return %arg0, %c0_i32 : i32, i32
  }
  func.func @transform_4(%arg0: i32, %arg1: i32) -> (i32, i32) {
    %c0_i32 = arith.constant 0 : i32
    %c0_i32_0 = arith.constant 0 : i32
    return %arg0, %c0_i32 : i32, i32
  }
}

</mosaic_0001>

<bundles_post_ra>
// kernel: tpu_custom_call.1
= control target key start
LH: loop header
LB: loop body
LE: loop exit
PB: predicated region body
PF: predicated region fallthrough
CT: control target
= control target key end

     0   :  { %s3819_s0 = inlined_call_operand.hbm [shape: bf16[512,512], index: 0, kind: input, shape index: {}]   ;;  %s3820_s1 = inlined_call_operand.hbm [shape: bf16[512,128], index: 1, kind: input, shape index: {}]   ;;  %s3821_s2 = inlined_call_operand.hbm [shape: f32[512,128], index: 2, kind: input, shape index: {}]   ;;  %s3822_s3 = inlined_call_operand.hbm [shape: bf16[512,128], index: 3, kind: output, shape index: {0}]   ;;  %s3823_s4 = inlined_call_operand.hbm [shape: f32[512,128], index: 4, kind: output, shape index: {1}]  }
   0x1   :  { %3833 = sst [smem:[#allocation19_spill]] %s3819_s0 }
   0x2   :  { %10 = vsyncpa [#allocation4], 0 }
   0x3   :  { %12 = vsyncpa [#allocation4 + $0x1], 0 }
   0x4   :  { %13 = vsyncpa [#allocation7], 0 }
   0x5   :  { %14 = vsyncpa [#allocation5], 0 }
   0x6   :  { %16 = vsyncpa [#allocation5 + $0x1], 0 }
   0x7   :  { %17 = vsyncpa [#allocation11], 0 }
   0x8   :  { %19 = vsyncpa [#allocation11 + $0x1], 0  ;;  %s3182_s15 = smov 0   ;;  %s3184_s16 = smov 0  }
   0x9   :  { %s3186_s17 = smov 0   ;;  %s3188_s18 = smov 0  }
   0xa   :  { %s3190_s19 = smov 0   ;;  %s3192_s20 = smov 0  }
   0xb LB: > { %3834 = sst [smem:[#allocation17_spill]] %s3136_s19  ;;  %s37_s21 = sadd.s32 1, %s3136_s19  ;;  %s3140_s20 = sphi %s3192_s20, %s25_s20   ;;  %s3136_s19 = sphi %s3190_s19, %s3854_s19   ;;  %s3132_s18 = sphi %s3188_s18, %s3853_s18   ;;  %s3128_s17 = sphi %s3186_s17, %s3857_s17   ;;  %s3124_s16 = sphi %s3184_s16, %s3856_s16   ;;  %s3120_s15 = sphi %s3182_s15, %s3855_s15  }
   0xc   : > { %s46_s22 = sadd.s32 1, %s3128_s17  ;;  %p39_p0 = scmp.ge.s32.totalorder %s37_s21, 2 }
   0xd   : > { %p53_p1 = scmp.ne.s32.totalorder %s3128_s17, %s3124_s16  ;;  %p54_p2 = scmp.eq.s32.totalorder %s3140_s20, 0 }
   0xe   : > { %s3859_s21 = smov (%p39_p0, %s37_s21), 0  ;;  %p2676_p5 = scmp.lt.s32.totalorder %s3140_s20, 2 }
   0xf   : > { %3835 = sst [smem:[#allocation18_spill]] %s3859_s21  ;;  %p55_p4 = por %p54_p2, %p53_p1 }
  0x10   : > { %s41_s23 = ssub.s32 %s3136_s19, %s3859_s21  ;;  %s203_s24 = sand.u32 1, %s3140_s20  }
  0x11   : > { %p44_p6 = scmp.eq.s32.totalorder %s41_s23, 0  ;;  %s205_s25 = sand.u32 1, %s3128_s17  }
  0x12   : > { %s2290_s26 = sshll.u32 %s3136_s19, 13  ;;  %s2140_s28 = sshll.u32 %s205_s25, 9 }
  0x13   : > { %s3230_s27 = scalar_select %p44_p6, %s3128_s17, %s46_s22  }
  0x14   : > { %s3836_s0 = sld [smem:[#allocation19_spill]]  ;;  %p3237_p7 = pnand %p2676_p5, %p55_p4 }
  0x15   : > { %s207_s7 = scalar_lea.vmem [#allocation3], %s2140_s28  ;;  %s3243_s9 = sshll.u32 %s205_s25, 8 }
  0x16   : > { %s3837_s6 = scalar_select %p3237_p7, 1, 0 }
  0x17   : > { %s217_s8 = sshll.u32 %s207_s7, 4  ;;  %s3245_s10 = scalar_lea.sflag [#allocation4], %s203_s24  ;;  %s3241_s8 = int_to_ptr.vmem [resolvable:$true] %s217_s8 }
  0x18   : > { %p3825_p9 = pneg %p3237_p7 }
  0x1a   : > { %s3235_s5 = scalar_lea.hbm %s3836_s0, %s2290_s26  ;;  %s2935_s14 = scalar_lea.hbm %s3836_s0, 16384 }
  0x1b   : > { %s2930_s11 = scalar_lea.hbm %s3235_s5, 8192  ;;  %p2936_p12 = scmp.lt.u32.totalorder %s3235_s5, %s3836_s0 }
  0x1c   : > { %p2931_p8 = scmp.ne.s32.totalorder %s3235_s5, %s2930_s11  ;;  %p2937_p13 = scmp.lt.u32.totalorder %s2935_s14, %s2930_s11 }
  0x1d   : > { %p2939_p2 = scmp.lt.u32.totalorder %s2930_s11, %s3235_s5 }
  0x1e   : > { %p2933_p10 = pnand %p3825_p9, %p2931_p8  ;;  %p2938_p0 = por %p2937_p13, %p2936_p12 }
  0x20   : > { %p2934_p11 = pneg %p2933_p10  ;;  %p2940_p4 = por %p2939_p2, %p2938_p0 }
  0x22   : > { %p2941_p5 = pnand %p2940_p4, %p2934_p11 }
  0x24   : > { %2944 = shalt.err (!%p2941_p5)
}
  0x25   : > { %s2945_s24 = scalar_lea.vmem %s3241_s8, 8192  ;;  %s3142_s25 = smov [#allocation3]  }
  0x26   : > { %p2946_p6 = scmp.ne.s32.totalorder %s3241_s8, %s2945_s24  ;;  %s2950_s26 = sshll.u32 %s3142_s25, 4  ;;  %s2951_s26 = int_to_ptr.vmem [resolvable:$false] %s2950_s26 }
  0x27   : > { %s2952_s28 = scalar_lea.vmem %s2951_s26, 16384  ;;  %p2953_p3 = scmp.lt.s32.totalorder %s3241_s8, %s2951_s26 }
  0x28   : > { %p2948_p8 = pnand %p2946_p6, %p3825_p9  ;;  %p2954_p12 = scmp.lt.s32.totalorder %s2952_s28, %s2945_s24 }
  0x2a   : > { %p2949_p10 = pneg %p2948_p8  ;;  %p2955_p13 = por %p2954_p12, %p2953_p3 }
  0x2c   : > { %p2956_p0 = pnand %p2955_p13, %p2949_p10 }
  0x2e   : > { %2959 = shalt.err (!%p2956_p0)
}
  0x2f   : > { %s3143_s29 = smov 256   ;;  %s3144_s30 = smov 16  }
  0x30   : > { %2664 = dma.hbm_to_vmem [thread:$0]  (!%p3237_p7), %s3235_s5, 8192, %s3241_s8, %s3245_s10, %s3143_s29, %s3143_s29, %s3144_s30  }
  0x31   : > { %s3274_s7 = sadd.s32 4294967295, %s3140_s20   ;;  %s2136_s11 = sadd.s32 4294967294, %s3140_s20  }
  0x32   : > { %p59_p3 = scmp.ne.s32.totalorder %s3124_s16, %s3120_s15  ;;  %p3824_p11 = scmp.eq.s32.totalorder %s3274_s7, 0 }
  0x33   : > { %p135_p2 = scmp.eq.s32.totalorder %s3274_s7, 1  ;;  %p141_p4 = scmp.eq.s32.totalorder %s2136_s11, 1 }
  0x34   : > { %p3283_p5 = por %p3824_p11, %p59_p3  ;;  %p2137_p6 = scmp.ge.s32.totalorder %s3140_s20, 1 }
  0x35   : > { %p3291_p8 = por %p135_p2, %p53_p1  ;;  %p3295_p10 = por %p141_p4, %p59_p3 }
  0x36   : > { %s3838_s12 = scalar_select %p3283_p5, 1, 0 }
  0x37   : > { %s3839_s5 = scalar_select %p3291_p8, 1, 0 }
  0x38   : > { %s3840_s8 = scalar_select %p3295_p10, 1, 0 }
  0x39   : > { %p174_p12 = scmp.lt.s32.totalorder %s3140_s20, 3  ;;  %s231_s13 = scalar_lea.vmem [#allocation8], %s3243_s9 }
  0x3a   : > { %s238_s14 = sshll.u32 %s231_s13, 4  ;;  %s3145_s23 = smov [#allocation6]   ;;  %s3319_s14 = int_to_ptr.vmem [resolvable:$true] %s238_s14 }
  0x3b   : > { %p3301_p13 = pnand %p2137_p6, %p174_p12  ;;  %s189_s24 = sshll.u32 %s3145_s23, 4  ;;  %s190_s24 = int_to_ptr.vmem [resolvable:$true] %s189_s24 }
  0x3c   : > { %s2291_s25 = sshll.u32 %s3136_s19, 12  ;;  %s2960_s13 = scalar_lea.hbm %s3820_s1, 4096 }
  0x3d   : > { %s3841_s22 = scalar_select %p3301_p13, 1, 0 }
  0x3e   : > { %p2657_p1 = pneg %p3301_p13  ;;  %s3311_s29 = scalar_lea.hbm %s3821_s2, %s2291_s25 }
  0x3f   : > { %p2961_p3 = scmp.ne.s32.totalorder %s3820_s1, %s2960_s13  ;;  %p2967_p12 = scmp.lt.u32.totalorder %s2960_s13, %s3820_s1 }
  0x40   : > { %p3315_p0 = pnand %p2657_p1, %p3824_p11 }
  0x42   : > { %p2962_p2 = pneg %p3315_p0 }
  0x44   : > { %p2963_p4 = pnand %p2962_p2, %p2961_p3 }
  0x46   : > { %p2964_p6 = pneg %p2963_p4 }
  0x48   : > { %p2969_p1 = pnand %p2967_p12, %p2964_p6 }
  0x4a   : > { %2972 = shalt.err (!%p2969_p1)
}
  0x4b   : > { %s2973_s28 = scalar_lea.vmem %s190_s24, 4096  ;;  %p2981_p8 = scmp.lt.s32.totalorder %s190_s24, %s190_s24 }
  0x4c   : > { %p2974_p11 = scmp.ne.s32.totalorder %s190_s24, %s2973_s28  ;;  %p2982_p5 = scmp.lt.s32.totalorder %s2973_s28, %s2973_s28 }
  0x4e   : > { %p2976_p9 = pnand %p2974_p11, %p2962_p2  ;;  %p2983_p13 = por %p2982_p5, %p2981_p8 }
  0x50   : > { %p2977_p10 = pneg %p2976_p9 }
  0x52   : > { %p2984_p7 = pnand %p2983_p13, %p2977_p10 }
  0x54   : > { %2987 = shalt.err (!%p2984_p7)
}
  0x55   : > { %s3146_s0 = smov 64   ;;  %s3147_s30 = smov 4  }
  0x56   : > { %2660 = dma.hbm_to_vmem [thread:$0]  (!%p3315_p0), %s3820_s1, 4096, %s190_s24, [#allocation7], %s3146_s0, %s3146_s0, %s3147_s30  }
  0x57   : > { %s2988_s23 = scalar_lea.hbm %s3311_s29, 4096  ;;  %p3843_p11 = scmp.ne.s32.totalorder %s3837_s6, 0 }
  0x58   : > { %p2989_p9 = scmp.ne.s32.totalorder %s3311_s29, %s2988_s23  ;;  %s2993_s28 = scalar_lea.hbm %s3821_s2, 8192 }
  0x59   : > { %p3844_p3 = pneg %p3843_p11  ;;  %p2994_p7 = scmp.lt.u32.totalorder %s3311_s29, %s3821_s2 }
  0x5a   : > { %p2995_p10 = scmp.lt.u32.totalorder %s2993_s28, %s2988_s23  ;;  %p2997_p2 = scmp.lt.u32.totalorder %s2988_s23, %s3311_s29 }
  0x5b   : > { %p2991_p5 = pnand %p2989_p9, %p3844_p3 }
  0x5c   : > { %p2996_p13 = por %p2995_p10, %p2994_p7 }
  0x5d   : > { %p2992_p8 = pneg %p2991_p5 }
  0x5e   : > { %p2998_p4 = por %p2997_p2, %p2996_p13 }
  0x60   : > { %p2999_p6 = pnand %p2998_p4, %p2992_p8 }
  0x62   : > { %3002 = shalt.err (!%p2999_p6)
}
  0x63   : > { %s3003_s24 = scalar_lea.vmem %s3319_s14, 4096  ;;  %p3845_p12 = pmov %p3844_p3 }
  0x64   : > { %p3004_p0 = scmp.ne.s32.totalorder %s3319_s14, %s3003_s24  ;;  %s3148_s9 = smov [#allocation8]  }
  0x65   : > { %s3008_s0 = sshll.u32 %s3148_s9, 4  ;;  %s3009_s0 = int_to_ptr.vmem [resolvable:$false] %s3008_s0 }
  0x66   : > { %p3006_p1 = pnand %p3004_p0, %p3845_p12  ;;  %s3010_s19 = scalar_lea.vmem %s3009_s0, 8192 }
  0x67   : > { %p3011_p3 = scmp.lt.s32.totalorder %s3319_s14, %s3009_s0  ;;  %p3012_p5 = scmp.lt.s32.totalorder %s3010_s19, %s3003_s24 }
  0x68   : > { %p3007_p9 = pneg %p3006_p1 }
  0x69   : > { %p3013_p7 = por %p3012_p5, %p3011_p3 }
  0x6b   : > { %p3014_p10 = pnand %p3013_p7, %p3007_p9 }
  0x6d   : > { %3017 = shalt.err (!%p3014_p10)
}
  0x6e   : > { %s3149_s21 = smov 128   ;;  %s3150_s30 = smov 8  }
  0x6f   : > { %2667 = dma.hbm_to_vmem [thread:$0]  (!%p3843_p11), %s3311_s29, 4096, %s3319_s14, %s3245_s10, %s3149_s21, %s3149_s21, %s3150_s30  }
  0x70   : > { %p3846_p8 = scmp.ne.s32.totalorder %s3841_s22, 0 }
  0x71   : > { %s252_s11 = sand.u32 (!%p3846_p8), 1, %s3274_s7   ;;  %s3365_s13 = sand.u32 (!%p3846_p8), 1, %s3124_s16  }
  0x72   : > { %250 = sbr.rel (%p3846_p8) target bundleno = 680 (0x2a8), region = 32  ;;  %s2148_s23 = sshll.u32 (!%p3846_p8), %s3365_s13, 9 }
  0x73   : > { %s253_s25 = scalar_lea.sflag (!%p3846_p8), [#allocation4], %s252_s11  ;;  %s3368_s26 = scalar_lea.vmem (!%p3846_p8), [#allocation3], %s2148_s23 }
  0x74   : > { %p3847_p13 = scmp.ne.s32.totalorder (!%p3846_p8), %s3838_s12, 0 }
  0x79   : > { %3099 = dma.done.wait (%p3847_p13), %s253_s25, 8192  }
  0x7a   : > { %3101 = vsyncadd (%p3847_p13), %s253_s25, 4294959104  ;;  %p3848_p11 = scmp.eq.s32.totalorder %s3274_s7, 0 }
  0x7c   : > { %3103 = dma.done.wait (%p3848_p11), [#allocation7], 4096   ;;  %p3849_p2 = pmov %p3848_p11 }
  0x7d   : > { %s2150_s6 = sshll.u32 %s3365_s13, 8 }
  0x7e   : > { %3105 = vsyncadd (%p3849_p2), [#allocation7], 4294963200  ;;  %s3381_s10 = scalar_lea.vmem [#allocation8], %s2150_s6 }
  0x7f   : > { %3107 = dma.done.wait (%p3847_p13), %s253_s25, 4096  }
  0x80   : > { %3109 = vsyncadd (%p3847_p13), %s253_s25, 4294963200  ;;  %v2738_v0 = vld [vmem:[#allocation6 + $0x40] sm:$0xff]   ;;  %v2742_v4 = vld [vmem:[#allocation6 + $0x48] sm:$0xff]   ;;  %s2151_s7 = sshll.u32 %s3365_s13, 7  ;;  %s2324_s14 = sshll.u32 %s3132_s18, 11 }
  0x81   : > { %v2739_v1 = vld [vmem:[#allocation6 + $0xc0] sm:$0xff]   ;;  %2421 = vmatprep.subr.bf16.mxu0 %v2738_v0  ;;  %v2743_v5 = vld [vmem:[#allocation6 + $0xc8] sm:$0xff]   ;;  %v2746_v8 = vld [vmem:[#allocation6 + $0x50] sm:$0xff]   ;;  %s3460_s12 = scalar_lea.vmem [#allocation9], %s2151_s7  ;;  %s3637_s24 = scalar_lea.hbm %s3822_s3, %s2324_s14 }
  0x82   : > { %v2740_v2 = vld [vmem:[#allocation6] sm:$0xff]   ;;  %2533 = vmatprep.subr.bf16.mxu1 %v2739_v1  ;;  %v2744_v6 = vld [vmem:[#allocation6 + $0x8] sm:$0xff]   ;;  %v2747_v9 = vld [vmem:[#allocation6 + $0xd0] sm:$0xff]   ;;  %s1971_s22 = sshll.u32 %s3460_s12, 4  ;;  %s1953_s9 = scalar_lea.sflag [#allocation5], %s3365_s13  ;;  %s3640_s22 = int_to_ptr.vmem [resolvable:$true] %s1971_s22 }
  0x83   : > { %v2741_v3 = vld [vmem:[#allocation6 + $0x80] sm:$0xff]   ;;  %2422 = vmatpush3.bf16.msra.mxu0 %v2740_v2  ;;  %v2745_v7 = vld [vmem:[#allocation6 + $0x88] sm:$0xff]   ;;  %v2748_v10 = vld [vmem:[#allocation6 + $0x10] sm:$0xff]   ;;  %s3018_s0 = scalar_lea.vmem %s3640_s22, 2048  ;;  %p3850_p6 = scmp.ne.s32.totalorder %s3839_s5, 0 }
  0x84   : > { %2534 = vmatpush3.bf16.msra.mxu1 %v2741_v3  ;;  %2423 = vmatprep.subr.bf16.mxu0 %v2742_v4  ;;  %v2749_v11 = vld [vmem:[#allocation6 + $0x90] sm:$0xff]   ;;  %v2750_v12 = vld [vmem:[#allocation6 + $0x58] sm:$0xff]   ;;  %v2754_v16 = vld [vmem:[#allocation6 + $0x60] sm:$0xff]   ;;  %p3019_p4 = scmp.ne.s32.totalorder %s3640_s22, %s3018_s0  ;;  %s3151_s19 = smov [#allocation9]  }
  0x85   : > { %2535 = vmatprep.subr.bf16.mxu1 %v2743_v5  ;;  %v2751_v13 = vld [vmem:[#allocation6 + $0xd8] sm:$0xff]   ;;  %v2755_v17 = vld [vmem:[#allocation6 + $0xe0] sm:$0xff]   ;;  %v2758_v20 = vld [vmem:[#allocation6 + $0x68] sm:$0xff]   ;;  %s3022_s21 = sshll.u32 %s3151_s19, 4  ;;  %s3023_s21 = int_to_ptr.vmem [resolvable:$false] %s3022_s21 }
  0x86   : > { %v2752_v14 = vld [vmem:[#allocation6 + $0x18] sm:$0xff]   ;;  %v2756_v18 = vld [vmem:[#allocation6 + $0x20] sm:$0xff]   ;;  %v2759_v21 = vld [vmem:[#allocation6 + $0xe8] sm:$0xff]   ;;  %p3020_p0 = pnand %p3019_p4, %p3850_p6  ;;  %s3024_s30 = scalar_lea.vmem %s3023_s21, 4096 }
  0x87   : > { %2424 = vmatpush3.bf16.msra.mxu0 %v2744_v6  ;;  %v2753_v15 = vld [vmem:[#allocation6 + $0x98] sm:$0xff]   ;;  %v2757_v19 = vld [vmem:[#allocation6 + $0xa0] sm:$0xff]   ;;  %v2760_v22 = vld [vmem:[#allocation6 + $0x28] sm:$0xff]   ;;  %p3025_p1 = scmp.lt.s32.totalorder %s3640_s22, %s3023_s21  ;;  %p3026_p9 = scmp.lt.s32.totalorder %s3024_s30, %s3018_s0 }
  0x88   : > { %2536 = vmatpush3.bf16.msra.mxu1 %v2745_v7  ;;  %2425 = vmatprep.subr.bf16.mxu0 %v2746_v8  ;;  %v2761_v23 = vld [vmem:[#allocation6 + $0xa8] sm:$0xff]   ;;  %v2762_v24 = vld [vmem:[#allocation6 + $0x70] sm:$0xff]   ;;  %v2766_v28 = vld [vmem:[#allocation6 + $0x78] sm:$0xff]   ;;  %p3021_p12 = pneg %p3020_p0 }
  0x89   : > { %2537 = vmatprep.subr.bf16.mxu1 %v2747_v9  ;;  %v2763_v25 = vld [vmem:[#allocation6 + $0xf0] sm:$0xff]   ;;  %v2767_v29 = vld [vmem:[#allocation6 + $0xf8] sm:$0xff]   ;;  %p3027_p3 = por %p3026_p9, %p3025_p1 }
  0x8a   : > { %v2764_v26 = vld [vmem:[#allocation6 + $0x30] sm:$0xff]   ;;  %v2768_v30 = vld [vmem:[#allocation6 + $0x38] sm:$0xff]  }
  0x8b   : > { %2426 = vmatpush3.bf16.msra.mxu0 %v2748_v10  ;;  %v2765_v27 = vld [vmem:[#allocation6 + $0xb0] sm:$0xff]   ;;  %v2769_v31 = vld [vmem:[#allocation6 + $0xb8] sm:$0xff]   ;;  %p3028_p5 = pnand %p3027_p3, %p3021_p12 }
  0x8c   : > { %2538 = vmatpush3.bf16.msra.mxu1 %v2749_v11  ;;  %2427 = vmatprep.subr.bf16.mxu0 %v2750_v12  ;;  %v2770_v32 = vld [vmem:[%s3368_s26] ss:$16 sps:$4 sm:$0xff]   ;;  %v2772_v33 = vld [vmem:[%s3368_s26 + $0x4] ss:$16 sps:$4 sm:$0xff]   ;;  %v2773_v34 = vld [vmem:[%s3368_s26 + $0x8] ss:$16 sps:$4 sm:$0xff]  }
  0x8d   : > { %2539 = vmatprep.subr.bf16.mxu1 %v2751_v13  ;;  %v2775_v35 = vld [vmem:[%s3368_s26 + $0xc] ss:$16 sps:$4 sm:$0xff]   ;;  %1051 = vmatprep.mubr.bf16.mxu0 %v2772_v33  ;;  %v2776_v36 = vld [vmem:[%s3368_s26 + $0x24] ss:$16 sps:$4 sm:$0xff]   ;;  %v2780_v38 = vld [vmem:[%s3368_s26 + $0x20] ss:$16 sps:$4 sm:$0xff]  }
  0x8e   : > { %1212 = vmatprep.mubr.bf16.mxu1 %v2775_v35  ;;  %v2778_v37 = vld [vmem:[%s3368_s26 + $0x2c] ss:$16 sps:$4 sm:$0xff]   ;;  %v2781_v39 = vld [vmem:[%s3368_s26 + $0x28] ss:$16 sps:$4 sm:$0xff]   ;;  %v2782_v40 = vld [vmem:[%s3368_s26 + $0x44] ss:$16 sps:$4 sm:$0xff]  }
  0x8f   : > { %2428 = vmatpush3.bf16.msra.mxu0 %v2752_v14  ;;  %v2784_v41 = vld [vmem:[%s3368_s26 + $0x4c] ss:$16 sps:$4 sm:$0xff]   ;;  %v2786_v42 = vld [vmem:[%s3368_s26 + $0x40] ss:$16 sps:$4 sm:$0xff]   ;;  %v2787_v43 = vld [vmem:[%s3368_s26 + $0x48] ss:$16 sps:$4 sm:$0xff]  }
  0x90   : > { %2540 = vmatpush3.bf16.msra.mxu1 %v2753_v15  ;;  %2429 = vmatprep.subr.bf16.mxu0 %v2754_v16  ;;  %v2788_v44 = vld [vmem:[%s3368_s26 + $0x64] ss:$16 sps:$4 sm:$0xff]   ;;  %v2790_v45 = vld [vmem:[%s3368_s26 + $0x6c] ss:$16 sps:$4 sm:$0xff]   ;;  %v2792_v46 = vld [vmem:[%s3368_s26 + $0x60] ss:$16 sps:$4 sm:$0xff]  }
  0x91   : > { %2541 = vmatprep.subr.bf16.mxu1 %v2755_v17  ;;  %v2793_v47 = vld [vmem:[%s3368_s26 + $0x68] ss:$16 sps:$4 sm:$0xff]   ;;  %v2794_v48 = vld [vmem:[%s3368_s26 + $0x84] ss:$16 sps:$4 sm:$0xff]   ;;  %v2796_v49 = vld [vmem:[%s3368_s26 + $0x8c] ss:$16 sps:$4 sm:$0xff]  }
  0x92   : > { %v2798_v50 = vld [vmem:[%s3368_s26 + $0x80] ss:$16 sps:$4 sm:$0xff]   ;;  %v2799_v51 = vld [vmem:[%s3368_s26 + $0x88] ss:$16 sps:$4 sm:$0xff]   ;;  %v2800_v52 = vld [vmem:[%s3368_s26 + $0xa4] ss:$16 sps:$4 sm:$0xff]  }
  0x93   : > { %2430 = vmatpush3.bf16.msra.mxu0 %v2756_v18  ;;  %v2802_v53 = vld [vmem:[%s3368_s26 + $0xac] ss:$16 sps:$4 sm:$0xff]   ;;  %v2804_v54 = vld [vmem:[%s3368_s26 + $0xa0] ss:$16 sps:$4 sm:$0xff]   ;;  %v2805_v55 = vld [vmem:[%s3368_s26 + $0xa8] ss:$16 sps:$4 sm:$0xff]  }
  0x94   : > { %2542 = vmatpush3.bf16.msra.mxu1 %v2757_v19  ;;  %2431 = vmatprep.subr.bf16.mxu0 %v2758_v20  ;;  %v2806_v56 = vld [vmem:[%s3368_s26 + $0xc4] ss:$16 sps:$4 sm:$0xff]   ;;  %v2808_v57 = vld [vmem:[%s3368_s26 + $0xcc] ss:$16 sps:$4 sm:$0xff]   ;;  %v2810_v58 = vld [vmem:[%s3368_s26 + $0xc0] ss:$16 sps:$4 sm:$0xff]  }
  0x95   : > { %2543 = vmatprep.subr.bf16.mxu1 %v2759_v21  ;;  %v2811_v59 = vld [vmem:[%s3368_s26 + $0xc8] ss:$16 sps:$4 sm:$0xff]   ;;  %v2812_v60 = vld [vmem:[%s3368_s26 + $0xe4] ss:$16 sps:$4 sm:$0xff]   ;;  %v2814_v61 = vld [vmem:[%s3368_s26 + $0xec] ss:$16 sps:$4 sm:$0xff]  }
  0x96   : > { %v2816_v62 = vld [vmem:[%s3368_s26 + $0xe0] ss:$16 sps:$4 sm:$0xff]   ;;  %v2817_v63 = vld [vmem:[%s3368_s26 + $0xe8] ss:$16 sps:$4 sm:$0xff]   ;;  %v2818_v0 = vld [vmem:[%s3368_s26 + $0x104] ss:$16 sps:$4 sm:$0xff]  }
  0x97   : > { %2432 = vmatpush3.bf16.msra.mxu0 %v2760_v22  ;;  %v2820_v1 = vld [vmem:[%s3368_s26 + $0x10c] ss:$16 sps:$4 sm:$0xff]   ;;  %v2822_v2 = vld [vmem:[%s3368_s26 + $0x100] ss:$16 sps:$4 sm:$0xff]   ;;  %v2823_v3 = vld [vmem:[%s3368_s26 + $0x108] ss:$16 sps:$4 sm:$0xff]  }
  0x98   : > { %2544 = vmatpush3.bf16.msra.mxu1 %v2761_v23  ;;  %2433 = vmatprep.subr.bf16.mxu0 %v2762_v24  ;;  %v2824_v4 = vld [vmem:[%s3368_s26 + $0x124] ss:$16 sps:$4 sm:$0xff]   ;;  %v2826_v5 = vld [vmem:[%s3368_s26 + $0x12c] ss:$16 sps:$4 sm:$0xff]   ;;  %v2828_v6 = vld [vmem:[%s3368_s26 + $0x120] ss:$16 sps:$4 sm:$0xff]  }
  0x99   : > { %2545 = vmatprep.subr.bf16.mxu1 %v2763_v25  ;;  %v2829_v7 = vld [vmem:[%s3368_s26 + $0x128] ss:$16 sps:$4 sm:$0xff]   ;;  %v2830_v8 = vld [vmem:[%s3368_s26 + $0x144] ss:$16 sps:$4 sm:$0xff]   ;;  %v2832_v9 = vld [vmem:[%s3368_s26 + $0x14c] ss:$16 sps:$4 sm:$0xff]  }
  0x9a   : > { %v2834_v10 = vld [vmem:[%s3368_s26 + $0x140] ss:$16 sps:$4 sm:$0xff]   ;;  %v2835_v11 = vld [vmem:[%s3368_s26 + $0x148] ss:$16 sps:$4 sm:$0xff]   ;;  %v2836_v12 = vld [vmem:[%s3368_s26 + $0x164] ss:$16 sps:$4 sm:$0xff]  }
  0x9b   : > { %2434 = vmatpush3.bf16.msra.mxu0 %v2764_v26  ;;  %v2838_v13 = vld [vmem:[%s3368_s26 + $0x16c] ss:$16 sps:$4 sm:$0xff]   ;;  %v2840_v14 = vld [vmem:[%s3368_s26 + $0x160] ss:$16 sps:$4 sm:$0xff]   ;;  %v2841_v15 = vld [vmem:[%s3368_s26 + $0x168] ss:$16 sps:$4 sm:$0xff]  }
  0x9c   : > { %2546 = vmatpush3.bf16.msra.mxu1 %v2765_v27  ;;  %2435 = vmatprep.subr.bf16.mxu0 %v2766_v28  ;;  %v2842_v16 = vld [vmem:[%s3368_s26 + $0x184] ss:$16 sps:$4 sm:$0xff]   ;;  %v2844_v17 = vld [vmem:[%s3368_s26 + $0x18c] ss:$16 sps:$4 sm:$0xff]   ;;  %v2846_v18 = vld [vmem:[%s3368_s26 + $0x180] ss:$16 sps:$4 sm:$0xff]  }
  0x9d   : > { %2547 = vmatprep.subr.bf16.mxu1 %v2767_v29  ;;  %v2847_v19 = vld [vmem:[%s3368_s26 + $0x188] ss:$16 sps:$4 sm:$0xff]   ;;  %v2848_v20 = vld [vmem:[%s3368_s26 + $0x1a4] ss:$16 sps:$4 sm:$0xff]   ;;  %v2850_v21 = vld [vmem:[%s3368_s26 + $0x1ac] ss:$16 sps:$4 sm:$0xff]  }
  0x9e   : > { %v2852_v22 = vld [vmem:[%s3368_s26 + $0x1a0] ss:$16 sps:$4 sm:$0xff]   ;;  %v2853_v23 = vld [vmem:[%s3368_s26 + $0x1a8] ss:$16 sps:$4 sm:$0xff]   ;;  %v2854_v24 = vld [vmem:[%s3368_s26 + $0x1c4] ss:$16 sps:$4 sm:$0xff]  }
  0x9f   : > { %2436 = vmatpush3.bf16.msra.mxu0 %v2768_v30  ;;  %v2856_v25 = vld [vmem:[%s3368_s26 + $0x1cc] ss:$16 sps:$4 sm:$0xff]   ;;  %v2858_v26 = vld [vmem:[%s3368_s26 + $0x1c0] ss:$16 sps:$4 sm:$0xff]   ;;  %v2859_v27 = vld [vmem:[%s3368_s26 + $0x1c8] ss:$16 sps:$4 sm:$0xff]  }
  0xa0   : > { %2548 = vmatpush3.bf16.msra.mxu1 %v2769_v31  ;;  %v2860_v28 = vld [vmem:[%s3368_s26 + $0x1e4] ss:$16 sps:$4 sm:$0xff]   ;;  %v2862_v29 = vld [vmem:[%s3368_s26 + $0x1ec] ss:$16 sps:$4 sm:$0xff]   ;;  %v2864_v30 = vld [vmem:[%s3368_s26 + $0x1e0] ss:$16 sps:$4 sm:$0xff]  }
  0xa1   : > { %v2865_v31 = vld [vmem:[%s3368_s26 + $0x1e8] ss:$16 sps:$4 sm:$0xff]  }
  0xa2   : > { %1052 = vmatmul.mubr.bf16.vlgmr.msra.gmra.mrb[0].mxu0 %v2770_v32 }
  0xa3   : > { %1213 = vmatmul.mubr.bf16.vlgmr.msra.gmra.mrb[0].mxu1 %v2773_v34  ;;  %1059 = vmatprep.mubr.bf16.mxu0 %v2776_v36 }
  0xa4   : > { %1220 = vmatprep.mubr.bf16.mxu1 %v2778_v37 }
  0xaa   : > { %1060 = vmatmul.mubr.bf16.gmra.mrb[4].mxu0 %v2780_v38 }
  0xab   : > { %1221 = vmatmul.mubr.bf16.gmra.mrb[4].mxu1 %v2781_v39  ;;  %1067 = vmatprep.mubr.bf16.mxu0 %v2782_v40 }
  0xac   : > { %1228 = vmatprep.mubr.bf16.mxu1 %v2784_v41 }
  0xb2   : > { %1068 = vmatmul.mubr.bf16.gmra.mrb[8].mxu0 %v2786_v42 }
  0xb3   : > { %1229 = vmatmul.mubr.bf16.gmra.mrb[8].mxu1 %v2787_v43  ;;  %1075 = vmatprep.mubr.bf16.mxu0 %v2788_v44 }
  0xb4   : > { %1236 = vmatprep.mubr.bf16.mxu1 %v2790_v45 }
  0xba   : > { %1076 = vmatmul.mubr.bf16.gmra.mrb[12].mxu0 %v2792_v46 }
  0xbb   : > { %1237 = vmatmul.mubr.bf16.gmra.mrb[12].mxu1 %v2793_v47  ;;  %1083 = vmatprep.mubr.bf16.mxu0 %v2794_v48 }
  0xbc   : > { %1244 = vmatprep.mubr.bf16.mxu1 %v2796_v49 }
  0xc2   : > { %1084 = vmatmul.mubr.bf16.gmra.mrb[16].mxu0 %v2798_v50 }
  0xc3   : > { %1245 = vmatmul.mubr.bf16.gmra.mrb[16].mxu1 %v2799_v51  ;;  %1091 = vmatprep.mubr.bf16.mxu0 %v2800_v52 }
  0xc4   : > { %1252 = vmatprep.mubr.bf16.mxu1 %v2802_v53 }
  0xca   : > { %1092 = vmatmul.mubr.bf16.gmra.mrb[20].mxu0 %v2804_v54 }
  0xcb   : > { %1253 = vmatmul.mubr.bf16.gmra.mrb[20].mxu1 %v2805_v55  ;;  %1099 = vmatprep.mubr.bf16.mxu0 %v2806_v56 }
  0xcc   : > { %1260 = vmatprep.mubr.bf16.mxu1 %v2808_v57 }
  0xd2   : > { %1100 = vmatmul.mubr.bf16.gmra.mrb[24].mxu0 %v2810_v58 }
  0xd3   : > { %1261 = vmatmul.mubr.bf16.gmra.mrb[24].mxu1 %v2811_v59  ;;  %1107 = vmatprep.mubr.bf16.mxu0 %v2812_v60 }
  0xd4   : > { %1268 = vmatprep.mubr.bf16.mxu1 %v2814_v61 }
  0xda   : > { %1108 = vmatmul.mubr.bf16.gmra.mrb[28].mxu0 %v2816_v62 }
  0xdb   : > { %1269 = vmatmul.mubr.bf16.gmra.mrb[28].mxu1 %v2817_v63  ;;  %1115 = vmatprep.mubr.bf16.mxu0 %v2818_v0 }
  0xdc   : > { %1276 = vmatprep.mubr.bf16.mxu1 %v2820_v1 }
  0xe2   : > { %1116 = vmatmul.mubr.bf16.gmra.mrb[32].mxu0 %v2822_v2 }
  0xe3   : > { %1277 = vmatmul.mubr.bf16.gmra.mrb[32].mxu1 %v2823_v3  ;;  %1123 = vmatprep.mubr.bf16.mxu0 %v2824_v4 }
  0xe4   : > { %1284 = vmatprep.mubr.bf16.mxu1 %v2826_v5 }
  0xea   : > { %1124 = vmatmul.mubr.bf16.gmra.mrb[36].mxu0 %v2828_v6 }
  0xeb   : > { %1285 = vmatmul.mubr.bf16.gmra.mrb[36].mxu1 %v2829_v7  ;;  %1131 = vmatprep.mubr.bf16.mxu0 %v2830_v8 }
  0xec   : > { %1292 = vmatprep.mubr.bf16.mxu1 %v2832_v9 }
  0xf2   : > { %1132 = vmatmul.mubr.bf16.gmra.mrb[40].mxu0 %v2834_v10 }
  0xf3   : > { %1293 = vmatmul.mubr.bf16.gmra.mrb[40].mxu1 %v2835_v11  ;;  %1139 = vmatprep.mubr.bf16.mxu0 %v2836_v12 }
  0xf4   : > { %1300 = vmatprep.mubr.bf16.mxu1 %v2838_v13 }
  0xfa   : > { %1140 = vmatmul.mubr.bf16.gmra.mrb[44].mxu0 %v2840_v14 }
  0xfb   : > { %1301 = vmatmul.mubr.bf16.gmra.mrb[44].mxu1 %v2841_v15  ;;  %1147 = vmatprep.mubr.bf16.mxu0 %v2842_v16 }
  0xfc   : > { %1308 = vmatprep.mubr.bf16.mxu1 %v2844_v17 }
 0x102   : > { %1148 = vmatmul.mubr.bf16.gmra.mrb[48].mxu0 %v2846_v18 }
 0x103   : > { %1309 = vmatmul.mubr.bf16.gmra.mrb[48].mxu1 %v2847_v19  ;;  %1155 = vmatprep.mubr.bf16.mxu0 %v2848_v20 }
 0x104   : > { %1316 = vmatprep.mubr.bf16.mxu1 %v2850_v21 }
 0x10a   : > { %1156 = vmatmul.mubr.bf16.gmra.mrb[52].mxu0 %v2852_v22 }
 0x10b   : > { %1317 = vmatmul.mubr.bf16.gmra.mrb[52].mxu1 %v2853_v23  ;;  %1163 = vmatprep.mubr.bf16.mxu0 %v2854_v24 }
 0x10c   : > { %1324 = vmatprep.mubr.bf16.mxu1 %v2856_v25 }
 0x112   : > { %1164 = vmatmul.mubr.bf16.gmra.mrb[56].mxu0 %v2858_v26 }
 0x113   : > { %1325 = vmatmul.mubr.bf16.gmra.mrb[56].mxu1 %v2859_v27  ;;  %1171 = vmatprep.mubr.bf16.mxu0 %v2860_v28 }
 0x114   : > { %1332 = vmatprep.mubr.bf16.mxu1 %v2862_v29 }
 0x11a   : > { %1172 = vmatmul.mubr.bf16.gmra.mrb[60].mxu0 %v2864_v30 }
 0x11b   : > { %1333 = vmatmul.mubr.bf16.gmra.mrb[60].mxu1 %v2865_v31 }
 0x175   : > { %v2437_v32 = vpop.f32.mrb[0].mxu0 }
 0x176   : > { %v2549_v33 = vpop.f32.mrb[0].mxu1  ;;  %v2438_v34 = vpop.f32.mrb[1].mxu0 }
 0x177   : > { %v2439_v35 = vadd.f32 %v2438_v34, %v2437_v32  ;;  %v2550_v36 = vpop.f32.mrb[1].mxu1  ;;  %v2440_v37 = vpop.f32.mrb[2].mxu0 }
 0x178   : > { %v2551_v38 = vadd.f32 %v2550_v36, %v2549_v33  ;;  %v2552_v39 = vpop.f32.mrb[2].mxu1  ;;  %v2441_v40 = vpop.f32.mrb[3].mxu0 }
 0x179   : > { %v2442_v41 = vadd.f32 %v2441_v40, %v2440_v37  ;;  %v2553_v42 = vpop.f32.mrb[3].mxu1 }
 0x17a   : > { %v3451_v43 = vadd.f32 %v2551_v38, %v2439_v35  ;;  %v2554_v44 = vadd.f32 %v2553_v42, %v2552_v39 }
 0x17c   : > { %v3454_v45 = vadd.f32 %v2554_v44, %v2442_v41  ;;  %v1600_v46 = vmul.f32 %v3451_v43, %v3451_v43 }
 0x17d   : > { %v2443_v47 = vpop.f32.mrb[4].mxu0 }
 0x17e   : > { %v2329_v48 = vpack.c.bf16 %v3454_v45, %v3451_v43  ;;  %v2555_v49 = vpop.f32.mrb[4].mxu1  ;;  %1632 = vadd.xlane.f32.xlu0 %v1600_v46  ;;  %v2444_v50 = vpop.f32.mrb[5].mxu0  ;;  %v1601_v57 = vmul.f32 %v3454_v45, %v3454_v45 }
 0x17f   : > { %v2445_v51 = vadd.f32 %v2444_v50, %v2443_v47  ;;  %v2556_v52 = vpop.f32.mrb[5].mxu1  ;;  %v2446_v53 = vpop.f32.mrb[6].mxu0 }
 0x180   : > { %2330 = vst [vmem:[%s3460_s12] sm:$0xff] %v2329_v48   ;;  %v2557_v54 = vadd.f32 %v2556_v52, %v2555_v49  ;;  %v2558_v55 = vpop.f32.mrb[6].mxu1  ;;  %v2447_v56 = vpop.f32.mrb[7].mxu0 }
 0x181   : > { %v2448_v58 = vadd.f32 %v2447_v56, %v2446_v53  ;;  %v2559_v59 = vpop.f32.mrb[7].mxu1 }
 0x182   : > { %v3465_v60 = vadd.f32 %v2557_v54, %v2445_v51  ;;  %v2560_v61 = vadd.f32 %v2559_v59, %v2558_v55  ;;  %1634 = vadd.xlane.f32.xlu0 %v1601_v57 }
 0x184   : > { %v3467_v62 = vadd.f32 %v2560_v61, %v2448_v58  ;;  %v1602_v63 = vmul.f32 %v3465_v60, %v3465_v60 }
 0x185   : > { %v2449_v0 = vpop.f32.mrb[8].mxu0 }
 0x186   : > { %v2334_v1 = vpack.c.bf16 %v3467_v62, %v3465_v60  ;;  %v2561_v2 = vpop.f32.mrb[8].mxu1  ;;  %1636 = vadd.xlane.f32.xlu1 %v1602_v63  ;;  %v2450_v3 = vpop.f32.mrb[9].mxu0  ;;  %v1603_v10 = vmul.f32 %v3467_v62, %v3467_v62 }
 0x187   : > { %v2451_v4 = vadd.f32 %v2450_v3, %v2449_v0  ;;  %v2562_v5 = vpop.f32.mrb[9].mxu1  ;;  %v2452_v6 = vpop.f32.mrb[10].mxu0 }
 0x188   : > { %2406 = vst [vmem:[%s3460_s12 + $0x8] sm:$0xff] %v2334_v1   ;;  %v2563_v7 = vadd.f32 %v2562_v5, %v2561_v2  ;;  %v2564_v8 = vpop.f32.mrb[10].mxu1  ;;  %v2453_v9 = vpop.f32.mrb[11].mxu0 }
 0x189   : > { %v2454_v11 = vadd.f32 %v2453_v9, %v2452_v6  ;;  %v2565_v12 = vpop.f32.mrb[11].mxu1 }
 0x18a   : > { %v3476_v13 = vadd.f32 %v2563_v7, %v2451_v4  ;;  %v2566_v14 = vadd.f32 %v2565_v12, %v2564_v8  ;;  %1638 = vadd.xlane.f32.xlu1 %v1603_v10 }
 0x18c   : > { %v3478_v15 = vadd.f32 %v2566_v14, %v2454_v11  ;;  %v1604_v16 = vmul.f32 %v3476_v13, %v3476_v13 }
 0x18d   : > { %v2455_v17 = vpop.f32.mrb[12].mxu0 }
 0x18e   : > { %v2339_v18 = vpack.c.bf16 %v3478_v15, %v3476_v13  ;;  %v2567_v19 = vpop.f32.mrb[12].mxu1  ;;  %1640 = vadd.xlane.f32.xlu0 %v1604_v16  ;;  %v2456_v20 = vpop.f32.mrb[13].mxu0  ;;  %v1605_v21 = vmul.f32 %v3478_v15, %v3478_v15 }
 0x18f   : > { %v2457_v22 = vadd.f32 %v2456_v20, %v2455_v17  ;;  %v2568_v23 = vpop.f32.mrb[13].mxu1  ;;  %v2458_v24 = vpop.f32.mrb[14].mxu0 }
 0x190   : > { %2407 = vst [vmem:[%s3460_s12 + $0x10] sm:$0xff] %v2339_v18   ;;  %v2569_v25 = vadd.f32 %v2568_v23, %v2567_v19  ;;  %v2570_v26 = vpop.f32.mrb[14].mxu1  ;;  %1642 = vadd.xlane.f32.xlu1 %v1605_v21  ;;  %v2459_v27 = vpop.f32.mrb[15].mxu0 }
 0x191   : > { %v2460_v28 = vadd.f32 %v2459_v27, %v2458_v24  ;;  %v2571_v29 = vpop.f32.mrb[15].mxu1 }
 0x192   : > { %v3487_v30 = vadd.f32 %v2569_v25, %v2457_v22  ;;  %v2572_v31 = vadd.f32 %v2571_v29, %v2570_v26 }
 0x194   : > { %v3489_v32 = vadd.f32 %v2572_v31, %v2460_v28  ;;  %v1606_v33 = vmul.f32 %v3487_v30, %v3487_v30 }
 0x195   : > { %v2461_v34 = vpop.f32.mrb[16].mxu0 }
 0x196   : > { %v2344_v35 = vpack.c.bf16 %v3489_v32, %v3487_v30  ;;  %v2573_v36 = vpop.f32.mrb[16].mxu1  ;;  %1644 = vadd.xlane.f32.xlu0 %v1606_v33  ;;  %v2462_v37 = vpop.f32.mrb[17].mxu0  ;;  %v1607_v38 = vmul.f32 %v3489_v32, %v3489_v32 }
 0x197   : > { %v2463_v39 = vadd.f32 %v2462_v37, %v2461_v34  ;;  %v2574_v40 = vpop.f32.mrb[17].mxu1  ;;  %v2464_v41 = vpop.f32.mrb[18].mxu0 }
 0x198   : > { %2408 = vst [vmem:[%s3460_s12 + $0x18] sm:$0xff] %v2344_v35   ;;  %v2575_v42 = vadd.f32 %v2574_v40, %v2573_v36  ;;  %v2576_v44 = vpop.f32.mrb[18].mxu1  ;;  %1646 = vadd.xlane.f32.xlu1 %v1607_v38  ;;  %v2465_v46 = vpop.f32.mrb[19].mxu0 }
 0x199   : > { %v2466_v47 = vadd.f32 %v2465_v46, %v2464_v41  ;;  %v2577_v48 = vpop.f32.mrb[19].mxu1 }
 0x19a   : > { %v3498_v49 = vadd.f32 %v2575_v42, %v2463_v39  ;;  %v2578_v50 = vadd.f32 %v2577_v48, %v2576_v44 }
 0x19c   : > { %v3500_v51 = vadd.f32 %v2578_v50, %v2466_v47  ;;  %v1608_v52 = vmul.f32 %v3498_v49, %v3498_v49 }
 0x19d   : > { %v2467_v53 = vpop.f32.mrb[20].mxu0 }
 0x19e   : > { %v2349_v54 = vpack.c.bf16 %v3500_v51, %v3498_v49  ;;  %v2579_v55 = vpop.f32.mrb[20].mxu1  ;;  %1648 = vadd.xlane.f32.xlu0 %v1608_v52  ;;  %v2468_v56 = vpop.f32.mrb[21].mxu0  ;;  %v1609_v57 = vmul.f32 %v3500_v51, %v3500_v51 }
 0x19f   : > { %v2469_v58 = vadd.f32 %v2468_v56, %v2467_v53  ;;  %v2580_v59 = vpop.f32.mrb[21].mxu1  ;;  %v2470_v61 = vpop.f32.mrb[22].mxu0 }
 0x1a0   : > { %2409 = vst [vmem:[%s3460_s12 + $0x20] sm:$0xff] %v2349_v54   ;;  %v2581_v63 = vadd.f32 %v2580_v59, %v2579_v55  ;;  %v2582_v0 = vpop.f32.mrb[22].mxu1  ;;  %1650 = vadd.xlane.f32.xlu1 %v1609_v57  ;;  %v2471_v1 = vpop.f32.mrb[23].mxu0 }
 0x1a1   : > { %v2472_v2 = vadd.f32 %v2471_v1, %v2470_v61  ;;  %v2583_v3 = vpop.f32.mrb[23].mxu1 }
 0x1a2   : > { %v3509_v4 = vadd.f32 %v2581_v63, %v2469_v58  ;;  %v2584_v5 = vadd.f32 %v2583_v3, %v2582_v0 }
 0x1a4   : > { %v3511_v6 = vadd.f32 %v2584_v5, %v2472_v2  ;;  %v1610_v7 = vmul.f32 %v3509_v4, %v3509_v4 }
 0x1a5   : > { %v2473_v8 = vpop.f32.mrb[24].mxu0 }
 0x1a6   : > { %v2354_v9 = vpack.c.bf16 %v3511_v6, %v3509_v4  ;;  %v2585_v10 = vpop.f32.mrb[24].mxu1  ;;  %1652 = vadd.xlane.f32.xlu0 %v1610_v7  ;;  %v2474_v11 = vpop.f32.mrb[25].mxu0  ;;  %v1611_v12 = vmul.f32 %v3511_v6, %v3511_v6 }
 0x1a7   : > { %v2475_v14 = vadd.f32 %v2474_v11, %v2473_v8  ;;  %v2586_v16 = vpop.f32.mrb[25].mxu1  ;;  %v2476_v17 = vpop.f32.mrb[26].mxu0 }
 0x1a8   : > { %2410 = vst [vmem:[%s3460_s12 + $0x28] sm:$0xff] %v2354_v9   ;;  %v2587_v18 = vadd.f32 %v2586_v16, %v2585_v10  ;;  %v2588_v19 = vpop.f32.mrb[26].mxu1  ;;  %1654 = vadd.xlane.f32.xlu1 %v1611_v12  ;;  %v2477_v20 = vpop.f32.mrb[27].mxu0 }
 0x1a9   : > { %v2478_v21 = vadd.f32 %v2477_v20, %v2476_v17  ;;  %v2589_v22 = vpop.f32.mrb[27].mxu1 }
 0x1aa   : > { %v3520_v23 = vadd.f32 %v2587_v18, %v2475_v14  ;;  %v2590_v24 = vadd.f32 %v2589_v22, %v2588_v19 }
 0x1ac   : > { %v3522_v25 = vadd.f32 %v2590_v24, %v2478_v21  ;;  %v1612_v26 = vmul.f32 %v3520_v23, %v3520_v23 }
 0x1ad   : > { %v2479_v27 = vpop.f32.mrb[28].mxu0 }
 0x1ae   : > { %v2359_v28 = vpack.c.bf16 %v3522_v25, %v3520_v23  ;;  %v2591_v29 = vpop.f32.mrb[28].mxu1  ;;  %1656 = vadd.xlane.f32.xlu0 %v1612_v26  ;;  %v2480_v31 = vpop.f32.mrb[29].mxu0  ;;  %v1613_v33 = vmul.f32 %v3522_v25, %v3522_v25 }
 0x1af   : > { %v2481_v34 = vadd.f32 %v2480_v31, %v2479_v27  ;;  %v2592_v35 = vpop.f32.mrb[29].mxu1  ;;  %v2482_v36 = vpop.f32.mrb[30].mxu0 }
 0x1b0   : > { %2411 = vst [vmem:[%s3460_s12 + $0x30] sm:$0xff] %v2359_v28   ;;  %v2593_v37 = vadd.f32 %v2592_v35, %v2591_v29  ;;  %v2594_v38 = vpop.f32.mrb[30].mxu1  ;;  %1658 = vadd.xlane.f32.xlu1 %v1613_v33  ;;  %v2483_v39 = vpop.f32.mrb[31].mxu0 }
 0x1b1   : > { %v2484_v40 = vadd.f32 %v2483_v39, %v2482_v36  ;;  %v2595_v41 = vpop.f32.mrb[31].mxu1 }
 0x1b2   : > { %v3531_v42 = vadd.f32 %v2593_v37, %v2481_v34  ;;  %v2596_v44 = vadd.f32 %v2595_v41, %v2594_v38 }
 0x1b4   : > { %v3533_v46 = vadd.f32 %v2596_v44, %v2484_v40  ;;  %v1614_v47 = vmul.f32 %v3531_v42, %v3531_v42 }
 0x1b5   : > { %v2485_v48 = vpop.f32.mrb[32].mxu0 }
 0x1b6   : > { %v2364_v50 = vpack.c.bf16 %v3533_v46, %v3531_v42  ;;  %v2597_v52 = vpop.f32.mrb[32].mxu1  ;;  %1660 = vadd.xlane.f32.xlu0 %v1614_v47  ;;  %v2486_v53 = vpop.f32.mrb[33].mxu0  ;;  %v1615_v54 = vmul.f32 %v3533_v46, %v3533_v46 }
 0x1b7   : > { %v2487_v55 = vadd.f32 %v2486_v53, %v2485_v48  ;;  %v2598_v56 = vpop.f32.mrb[33].mxu1  ;;  %v2488_v57 = vpop.f32.mrb[34].mxu0 }
 0x1b8   : > { %2412 = vst [vmem:[%s3460_s12 + $0x38] sm:$0xff] %v2364_v50   ;;  %v2599_v58 = vadd.f32 %v2598_v56, %v2597_v52  ;;  %v2600_v59 = vpop.f32.mrb[34].mxu1  ;;  %1662 = vadd.xlane.f32.xlu1 %v1615_v54  ;;  %v2489_v61 = vpop.f32.mrb[35].mxu0 }
 0x1b9   : > { %v2490_v63 = vadd.f32 %v2489_v61, %v2488_v57  ;;  %v2601_v0 = vpop.f32.mrb[35].mxu1 }
 0x1ba   : > { %v3542_v1 = vadd.f32 %v2599_v58, %v2487_v55  ;;  %v2602_v2 = vadd.f32 %v2601_v0, %v2600_v59 }
 0x1bc   : > { %v3544_v3 = vadd.f32 %v2602_v2, %v2490_v63  ;;  %v1616_v5 = vmul.f32 %v3542_v1, %v3542_v1 }
 0x1bd   : > { %v2491_v7 = vpop.f32.mrb[36].mxu0 }
 0x1be   : > { %v2369_v8 = vpack.c.bf16 %v3544_v3, %v3542_v1  ;;  %v2603_v9 = vpop.f32.mrb[36].mxu1  ;;  %1664 = vadd.xlane.f32.xlu0 %v1616_v5  ;;  %v2492_v10 = vpop.f32.mrb[37].mxu0  ;;  %v1617_v11 = vmul.f32 %v3544_v3, %v3544_v3 }
 0x1bf   : > { %v2493_v12 = vadd.f32 %v2492_v10, %v2491_v7  ;;  %v2604_v14 = vpop.f32.mrb[37].mxu1  ;;  %v2494_v16 = vpop.f32.mrb[38].mxu0 }
 0x1c0   : > { %2413 = vst [vmem:[%s3460_s12 + $0x40] sm:$0xff] %v2369_v8   ;;  %v2605_v17 = vadd.f32 %v2604_v14, %v2603_v9  ;;  %v2606_v18 = vpop.f32.mrb[38].mxu1  ;;  %1666 = vadd.xlane.f32.xlu1 %v1617_v11  ;;  %v2495_v19 = vpop.f32.mrb[39].mxu0 }
 0x1c1   : > { %v2496_v20 = vadd.f32 %v2495_v19, %v2494_v16  ;;  %v2607_v21 = vpop.f32.mrb[39].mxu1 }
 0x1c2   : > { %v3553_v22 = vadd.f32 %v2605_v17, %v2493_v12  ;;  %v2608_v24 = vadd.f32 %v2607_v21, %v2606_v18 }
 0x1c4   : > { %v3555_v26 = vadd.f32 %v2608_v24, %v2496_v20  ;;  %v1618_v27 = vmul.f32 %v3553_v22, %v3553_v22 }
 0x1c5   : > { %v2497_v28 = vpop.f32.mrb[40].mxu0 }
 0x1c6   : > { %v2374_v29 = vpack.c.bf16 %v3555_v26, %v3553_v22  ;;  %v2609_v31 = vpop.f32.mrb[40].mxu1  ;;  %1668 = vadd.xlane.f32.xlu0 %v1618_v27  ;;  %v2498_v33 = vpop.f32.mrb[41].mxu0  ;;  %v1619_v34 = vmul.f32 %v3555_v26, %v3555_v26 }
 0x1c7   : > { %v2499_v35 = vadd.f32 %v2498_v33, %v2497_v28  ;;  %v2610_v36 = vpop.f32.mrb[41].mxu1  ;;  %v2500_v37 = vpop.f32.mrb[42].mxu0 }
 0x1c8   : > { %2414 = vst [vmem:[%s3460_s12 + $0x48] sm:$0xff] %v2374_v29   ;;  %v2611_v38 = vadd.f32 %v2610_v36, %v2609_v31  ;;  %v2612_v39 = vpop.f32.mrb[42].mxu1  ;;  %1670 = vadd.xlane.f32.xlu1 %v1619_v34  ;;  %v2501_v40 = vpop.f32.mrb[43].mxu0 }
 0x1c9   : > { %v2502_v41 = vadd.f32 %v2501_v40, %v2500_v37  ;;  %v2613_v44 = vpop.f32.mrb[43].mxu1 }
 0x1ca   : > { %v3564_v47 = vadd.f32 %v2611_v38, %v2499_v35  ;;  %v2614_v48 = vadd.f32 %v2613_v44, %v2612_v39 }
 0x1cc   : > { %v3566_v50 = vadd.f32 %v2614_v48, %v2502_v41  ;;  %v1620_v52 = vmul.f32 %v3564_v47, %v3564_v47 }
 0x1cd   : > { %v2503_v53 = vpop.f32.mrb[44].mxu0 }
 0x1ce   : > { %v2379_v54 = vpack.c.bf16 %v3566_v50, %v3564_v47  ;;  %v2615_v55 = vpop.f32.mrb[44].mxu1  ;;  %1672 = vadd.xlane.f32.xlu0 %v1620_v52  ;;  %v2504_v56 = vpop.f32.mrb[45].mxu0  ;;  %v1621_v57 = vmul.f32 %v3566_v50, %v3566_v50 }
 0x1cf   : > { %v2505_v58 = vadd.f32 %v2504_v56, %v2503_v53  ;;  %v2616_v59 = vpop.f32.mrb[45].mxu1  ;;  %v2506_v61 = vpop.f32.mrb[46].mxu0 }
 0x1d0   : > { %2415 = vst [vmem:[%s3460_s12 + $0x50] sm:$0xff] %v2379_v54   ;;  %v2617_v63 = vadd.f32 %v2616_v59, %v2615_v55  ;;  %v2618_v0 = vpop.f32.mrb[46].mxu1  ;;  %1674 = vadd.xlane.f32.xlu1 %v1621_v57  ;;  %v2507_v2 = vpop.f32.mrb[47].mxu0 }
 0x1d1   : > { %v2508_v5 = vadd.f32 %v2507_v2, %v2506_v61  ;;  %v2619_v7 = vpop.f32.mrb[47].mxu1 }
 0x1d2   : > { %v3575_v8 = vadd.f32 %v2617_v63, %v2505_v58  ;;  %v2620_v9 = vadd.f32 %v2619_v7, %v2618_v0 }
 0x1d4   : > { %v3577_v10 = vadd.f32 %v2620_v9, %v2508_v5  ;;  %v1622_v11 = vmul.f32 %v3575_v8, %v3575_v8 }
 0x1d5   : > { %v2509_v12 = vpop.f32.mrb[48].mxu0 }
 0x1d6   : > { %v2384_v14 = vpack.c.bf16 %v3577_v10, %v3575_v8  ;;  %v2621_v16 = vpop.f32.mrb[48].mxu1  ;;  %1676 = vadd.xlane.f32.xlu0 %v1622_v11  ;;  %v2510_v17 = vpop.f32.mrb[49].mxu0  ;;  %v1623_v18 = vmul.f32 %v3577_v10, %v3577_v10 }
 0x1d7   : > { %v2511_v19 = vadd.f32 %v2510_v17, %v2509_v12  ;;  %v2622_v20 = vpop.f32.mrb[49].mxu1  ;;  %v2512_v21 = vpop.f32.mrb[50].mxu0 }
 0x1d8   : > { %2416 = vst [vmem:[%s3460_s12 + $0x58] sm:$0xff] %v2384_v14   ;;  %v2623_v24 = vadd.f32 %v2622_v20, %v2621_v16  ;;  %v2624_v27 = vpop.f32.mrb[50].mxu1  ;;  %1678 = vadd.xlane.f32.xlu1 %v1623_v18  ;;  %v2513_v28 = vpop.f32.mrb[51].mxu0 }
 0x1d9   : > { %v2514_v29 = vadd.f32 %v2513_v28, %v2512_v21  ;;  %v2625_v31 = vpop.f32.mrb[51].mxu1 }
 0x1da   : > { %v3586_v33 = vadd.f32 %v2623_v24, %v2511_v19  ;;  %v2626_v34 = vadd.f32 %v2625_v31, %v2624_v27 }
 0x1dc   : > { %v3588_v35 = vadd.f32 %v2626_v34, %v2514_v29  ;;  %v1624_v36 = vmul.f32 %v3586_v33, %v3586_v33 }
 0x1dd   : > { %v2515_v37 = vpop.f32.mrb[52].mxu0 }
 0x1de   : > { %v2389_v38 = vpack.c.bf16 %v3588_v35, %v3586_v33  ;;  %v2627_v39 = vpop.f32.mrb[52].mxu1  ;;  %1680 = vadd.xlane.f32.xlu0 %v1624_v36  ;;  %v2516_v40 = vpop.f32.mrb[53].mxu0  ;;  %v1625_v41 = vmul.f32 %v3588_v35, %v3588_v35 }
 0x1df   : > { %v2517_v44 = vadd.f32 %v2516_v40, %v2515_v37  ;;  %v2628_v48 = vpop.f32.mrb[53].mxu1  ;;  %v2518_v52 = vpop.f32.mrb[54].mxu0 }
 0x1e0   : > { %2417 = vst [vmem:[%s3460_s12 + $0x60] sm:$0xff] %v2389_v38   ;;  %v2629_v53 = vadd.f32 %v2628_v48, %v2627_v39  ;;  %v2630_v54 = vpop.f32.mrb[54].mxu1  ;;  %1682 = vadd.xlane.f32.xlu1 %v1625_v41  ;;  %v2519_v55 = vpop.f32.mrb[55].mxu0 }
 0x1e1   : > { %v2520_v56 = vadd.f32 %v2519_v55, %v2518_v52  ;;  %v2631_v57 = vpop.f32.mrb[55].mxu1 }
 0x1e2   : > { %v3597_v58 = vadd.f32 %v2629_v53, %v2517_v44  ;;  %v2632_v59 = vadd.f32 %v2631_v57, %v2630_v54 }
 0x1e4   : > { %v3599_v61 = vadd.f32 %v2632_v59, %v2520_v56  ;;  %v1626_v63 = vmul.f32 %v3597_v58, %v3597_v58 }
 0x1e5   : > { %v2521_v0 = vpop.f32.mrb[56].mxu0 }
 0x1e6   : > { %v2394_v2 = vpack.c.bf16 %v3599_v61, %v3597_v58  ;;  %v2633_v5 = vpop.f32.mrb[56].mxu1  ;;  %1684 = vadd.xlane.f32.xlu0 %v1626_v63  ;;  %v2522_v7 = vpop.f32.mrb[57].mxu0  ;;  %v1627_v9 = vmul.f32 %v3599_v61, %v3599_v61 }
 0x1e7   : > { %v2523_v11 = vadd.f32 %v2522_v7, %v2521_v0  ;;  %v2634_v12 = vpop.f32.mrb[57].mxu1  ;;  %v2524_v14 = vpop.f32.mrb[58].mxu0 }
 0x1e8   : > { %2418 = vst [vmem:[%s3460_s12 + $0x68] sm:$0xff] %v2394_v2   ;;  %v2635_v16 = vadd.f32 %v2634_v12, %v2633_v5  ;;  %v2636_v17 = vpop.f32.mrb[58].mxu1  ;;  %1686 = vadd.xlane.f32.xlu1 %v1627_v9  ;;  %v2525_v18 = vpop.f32.mrb[59].mxu0  ;;  %v1792_v12 = vld [vmem:[%s3381_s10] sm:$0xff] }
 0x1e9   : > { %v2526_v19 = vadd.f32 %v2525_v18, %v2524_v14  ;;  %v2637_v20 = vpop.f32.mrb[59].mxu1  ;;  %v1824_v18 = vmul.f32 0.33333334, %v1792_v12 }
 0x1ea   : > { %v3608_v21 = vadd.f32 %v2635_v16, %v2523_v11  ;;  %v2638_v24 = vadd.f32 %v2637_v20, %v2636_v17  ;;  %v1793_v20 = vld [vmem:[%s3381_s10 + $0x8] sm:$0xff] }
 0x1ec   : > { %v3610_v27 = vadd.f32 %v2638_v24, %v2526_v19  ;;  %v1628_v28 = vmul.f32 %v3608_v21, %v3608_v21 }
 0x1ed   : > { %v2527_v29 = vpop.f32.mrb[60].mxu0 }
 0x1ee   : > { %v2399_v31 = vpack.c.bf16 %v3610_v27, %v3608_v21  ;;  %v2639_v34 = vpop.f32.mrb[60].mxu1  ;;  %1688 = vadd.xlane.f32.xlu0 %v1628_v28  ;;  %v2528_v36 = vpop.f32.mrb[61].mxu0  ;;  %v1629_v37 = vmul.f32 %v3610_v27, %v3610_v27 }
 0x1ef   : > { %v2529_v38 = vadd.f32 %v2528_v36, %v2527_v29  ;;  %v2640_v39 = vpop.f32.mrb[61].mxu1  ;;  %v2530_v40 = vpop.f32.mrb[62].mxu0 }
 0x1f0   : > { %2419 = vst [vmem:[%s3460_s12 + $0x70] sm:$0xff] %v2399_v31   ;;  %v2641_v41 = vadd.f32 %v2640_v39, %v2639_v34  ;;  %v2642_v44 = vpop.f32.mrb[62].mxu1  ;;  %1690 = vadd.xlane.f32.xlu1 %v1629_v37  ;;  %v2531_v48 = vpop.f32.mrb[63].mxu0 }
 0x1f1   : > { %v2532_v52 = vadd.f32 %v2531_v48, %v2530_v40  ;;  %v2643_v53 = vpop.f32.mrb[63].mxu1 }
 0x1f2   : > { %v3619_v54 = vadd.f32 %v2641_v41, %v2529_v38  ;;  %v2644_v55 = vadd.f32 %v2643_v53, %v2642_v44 }
 0x1f4   : > { %v3621_v56 = vadd.f32 %v2644_v55, %v2532_v52  ;;  %v1630_v57 = vmul.f32 %v3619_v54, %v3619_v54 }
 0x1f6   : > { %v2404_v59 = vpack.c.bf16 %v3621_v56, %v3619_v54  ;;  %1692 = vadd.xlane.f32.xlu0 %v1630_v57  ;;  %v1631_v63 = vmul.f32 %v3621_v56, %v3621_v56 }
 0x1f8   : > { %2420 = vst [vmem:[%s3460_s12 + $0x78] sm:$0xff] %v2404_v59   ;;  %1694 = vadd.xlane.f32.xlu1 %v1631_v63 }
 0x20b   : > { %v1633_v0 = vpop.xlane.xlu0 %1632 }
 0x20c   : > { %v1696_v2 = vmax.f32 %v1633_v0, 1e-24 }
 0x20e   : > { %2866 = vrsqrt.f32 %v1696_v2 }
 0x20f   : > { %v1635_v5 = vpop.xlane.xlu0 %1634 }
 0x210   : > { %v1697_v7 = vmax.f32 %v1635_v5, 1e-24 }
 0x212   : > { %2868 = vrsqrt.f32 %v1697_v7 }
 0x213   : > { %v1637_v9 = vpop.xlane.xlu1 %1636 }
 0x214   : > { %v1698_v11 = vmax.f32 %v1637_v9, 1e-24 }
 0x216   : > { %2870 = vrsqrt.f32 %v1698_v11 }
 0x217   : > { %v1639_v14 = vpop.xlane.xlu1 %1638 }
 0x218   : > { %v2867_v16 = vpop.eup %2866  ;;  %v1699_v17 = vmax.f32 %v1639_v14, 1e-24 }
 0x219   : > { %v1760_v19 = vmul.f32 %v2867_v16, %v3451_v43 }
 0x21a   : > { %2872 = vrsqrt.f32 %v1699_v17 }
 0x21b   : > { %v1856_v24 = vmul.f32 0.33333334, %v1760_v19  ;;  %v1641_v28 = vpop.xlane.xlu0 %1640 }
 0x21c   : > { %v2869_v29 = vpop.eup %2868  ;;  %v1700_v31 = vmax.f32 %v1641_v28, 1e-24 }
 0x21d   : > { %3031 = shalt.err (!%p3028_p5)
}
 0x21e   : > { %s3032_s11 = scalar_lea.hbm %s3637_s24, 2048  ;;  %s3036_s26 = scalar_lea.hbm %s3822_s3, 4096 }
 0x21f   : > { %p3033_p7 = scmp.ne.s32.totalorder %s3637_s24, %s3032_s11  ;;  %p3037_p13 = scmp.lt.u32.totalorder %s3637_s24, %s3822_s3 }
 0x220   : > { %p3038_p11 = scmp.lt.u32.totalorder %s3036_s26, %s3032_s11  ;;  %p3040_p4 = scmp.lt.u32.totalorder %s3032_s11, %s3637_s24 }
 0x221   : > { %p3034_p10 = pnand %p3033_p7, %p3850_p6 }
 0x222   : > { %p3039_p2 = por %p3038_p11, %p3037_p13 }
 0x223   : > { %p3035_p8 = pneg %p3034_p10 }
 0x224   : > { %p3041_p0 = por %p3040_p4, %p3039_p2 }
 0x226   : > { %p3042_p12 = pnand %p3041_p0, %p3035_p8 }
 0x228   : > { %3045 = shalt.err (!%p3042_p12)
}
 0x229   : > { %s3152_s14 = smov 64   ;;  %s3153_s29 = smov 4   ;;  %v1888_v43 = vadd.f32 %v1856_v24, %v1824_v18  ;;  %v1825_v34 = vmul.f32 0.33333334, %v1793_v20  ;;  %v1761_v36 = vmul.f32 %v2869_v29, %v3454_v45  ;;  %v1643_v37 = vpop.xlane.xlu1 %1642  ;;  %v1794_v38 = vld [vmem:[%s3381_s10 + $0x10] sm:$0xff]  ;;  %2874 = vrsqrt.f32 %v1700_v31  ;;  %v2871_v41 = vpop.eup %2870  ;;  %v1795_v45 = vld [vmem:[%s3381_s10 + $0x18] sm:$0xff] }
 0x22a   : > { %2653 = dma.vmem_to_hbm [thread:$0]  (%p3850_p6), %s3640_s22, 2048, %s3637_s24, %s1953_s9, %s3152_s14, %s3152_s14, %s3153_s29   ;;  %v1701_v39 = vmax.f32 %v1643_v37, 1e-24  ;;  %v1826_v48 = vmul.f32 0.33333334, %v1794_v38  ;;  %v1762_v52 = vmul.f32 %v2871_v41, %v3465_v60  ;;  %v1645_v55 = vpop.xlane.xlu0 %1644  ;;  %v2873_v57 = vpop.eup %2872 }
 0x22b   : > { %s3670_s28 = scalar_lea.vmem [#allocation10], %s2150_s6  ;;  %v1857_v40 = vmul.f32 0.33333334, %v1761_v36  ;;  %v1702_v59 = vmax.f32 %v1645_v55, 1e-24  ;;  %v1763_v2 = vmul.f32 %v2873_v57, %v3467_v62  ;;  %v1796_v7 = vld [vmem:[%s3381_s10 + $0x20] sm:$0xff] }
 0x22c   : > { %1920 = vst [vmem:[%s3670_s28] sm:$0xff] %v1888_v43  ;;  %2876 = vrsqrt.f32 %v1701_v39  ;;  %v1858_v53 = vmul.f32 0.33333334, %v1762_v52  ;;  %v1827_v0 = vmul.f32 0.33333334, %v1795_v45  ;;  %v1797_v60 = vld [vmem:[%s3381_s10 + $0x28] sm:$0xff]  ;;  %v1799_v38 = vld [vmem:[%s3381_s10 + $0x38] sm:$0xff] }
 0x22d   : > { %v1889_v44 = vadd.f32 %v1857_v40, %v1825_v34  ;;  %v1647_v5 = vpop.xlane.xlu1 %1646  ;;  %2878 = vrsqrt.f32 %v1702_v59  ;;  %v1859_v11 = vmul.f32 0.33333334, %v1763_v2  ;;  %v1828_v16 = vmul.f32 0.33333334, %v1796_v7  ;;  %v1798_v34 = vld [vmem:[%s3381_s10 + $0x30] sm:$0xff]  ;;  %v1800_v59 = vld [vmem:[%s3381_s10 + $0x40] sm:$0xff] }
 0x22e   : > { %v1890_v63 = vadd.f32 %v1858_v53, %v1826_v48  ;;  %v1703_v9 = vmax.f32 %v1647_v5, 1e-24  ;;  %v1829_v62 = vmul.f32 0.33333334, %v1797_v60  ;;  %v1649_v24 = vpop.xlane.xlu0 %1648  ;;  %v1830_v39 = vmul.f32 0.33333334, %v1798_v34 }
 0x22f   : > { %1921 = vst [vmem:[%s3670_s28 + $0x8] sm:$0xff] %v1889_v44  ;;  %v1891_v14 = vadd.f32 %v1859_v11, %v1827_v0  ;;  %v1704_v28 = vmax.f32 %v1649_v24, 1e-24  ;;  %v1831_v44 = vmul.f32 0.33333334, %v1799_v38  ;;  %s2325_s6 = sshll.u32 %s3132_s18, 12 }
 0x230   : > { %1922 = vst [vmem:[%s3670_s28 + $0x10] sm:$0xff] %v1890_v63  ;;  %2880 = vrsqrt.f32 %v1703_v9  ;;  %v1832_v5 = vmul.f32 0.33333334, %v1800_v59  ;;  %s1987_s22 = sshll.u32 %s3670_s28, 4  ;;  %s1958_s0 = scalar_lea.sflag [#allocation11], %s3365_s13  ;;  %s3768_s22 = int_to_ptr.vmem [resolvable:$true] %s1987_s22 }
 0x231   : > { %1923 = vst [vmem:[%s3670_s28 + $0x18] sm:$0xff] %v1891_v14  ;;  %v1651_v43 = vpop.xlane.xlu1 %1650  ;;  %2882 = vrsqrt.f32 %v1704_v28  ;;  %s3046_s19 = scalar_lea.vmem %s3768_s22, 4096  ;;  %s3154_s18 = smov [#allocation10]  }
 0x232   : > { %v1705_v36 = vmax.f32 %v1651_v43, 1e-24  ;;  %p3047_p1 = scmp.ne.s32.totalorder %s3768_s22, %s3046_s19  ;;  %s3050_s21 = sshll.u32 %s3154_s18, 4  ;;  %s3051_s21 = int_to_ptr.vmem [resolvable:$false] %s3050_s21 }
 0x233   : > { %v2875_v12 = vpop.eup %2874  ;;  %v1653_v52 = vpop.xlane.xlu0 %1652  ;;  %s3052_s30 = scalar_lea.vmem %s3051_s21, 8192  ;;  %p3053_p5 = scmp.lt.s32.totalorder %s3768_s22, %s3051_s21 }
 0x234   : > { %v1764_v17 = vmul.f32 %v2875_v12, %v3476_v13  ;;  %2884 = vrsqrt.f32 %v1705_v36  ;;  %v1706_v45 = vmax.f32 %v1653_v52, 1e-24  ;;  %p3048_p9 = pnand %p3047_p1, %p3850_p6  ;;  %p3054_p7 = scmp.lt.s32.totalorder %s3052_s30, %s3046_s19 }
 0x235   : > { %v1655_v57 = vpop.xlane.xlu1 %1654 }
 0x236   : > { %v2877_v18 = vpop.eup %2876  ;;  %v1860_v19 = vmul.f32 0.33333334, %v1764_v17  ;;  %2886 = vrsqrt.f32 %v1706_v45  ;;  %v1707_v63 = vmax.f32 %v1655_v57, 1e-24  ;;  %p3049_p3 = pneg %p3048_p9  ;;  %p3055_p10 = por %p3054_p7, %p3053_p5 }
 0x237   : > { %v1765_v20 = vmul.f32 %v2877_v18, %v3478_v15  ;;  %v2879_v13 = vpop.eup %2878 }
 0x238   : > { %v1892_v29 = vadd.f32 %v1860_v19, %v1828_v16  ;;  %v1766_v40 = vmul.f32 %v2879_v13, %v3487_v30  ;;  %v1801_v30 = vld [vmem:[%s3381_s10 + $0x48] sm:$0xff]  ;;  %2888 = vrsqrt.f32 %v1707_v63  ;;  %v1802_v19 = vld [vmem:[%s3381_s10 + $0x50] sm:$0xff]  ;;  %p3056_p8 = pnand %p3055_p10, %p3049_p3 }
 0x239   : > { %v1861_v31 = vmul.f32 0.33333334, %v1765_v20  ;;  %v1833_v11 = vmul.f32 0.33333334, %v1801_v30  ;;  %v1834_v28 = vmul.f32 0.33333334, %v1802_v19 }
 0x23a   : > { %1924 = vst [vmem:[%s3670_s28 + $0x20] sm:$0xff] %v1892_v29  ;;  %v2881_v15 = vpop.eup %2880  ;;  %v1862_v41 = vmul.f32 0.33333334, %v1766_v40  ;;  %v1804_v40 = vld [vmem:[%s3381_s10 + $0x60] sm:$0xff]  ;;  %v1806_v30 = vld [vmem:[%s3381_s10 + $0x70] sm:$0xff] }
 0x23b   : > { %v1893_v37 = vadd.f32 %v1861_v31, %v1829_v62  ;;  %v1767_v48 = vmul.f32 %v2881_v15, %v3489_v32  ;;  %v2883_v2 = vpop.eup %2882  ;;  %v1657_v60 = vpop.xlane.xlu0 %1656 }
 0x23c   : > { %v1894_v53 = vadd.f32 %v1862_v41, %v1830_v39  ;;  %v1768_v7 = vmul.f32 %v2883_v2, %v3498_v49  ;;  %v1708_v14 = vmax.f32 %v1657_v60, 1e-24  ;;  %v1803_v49 = vld [vmem:[%s3381_s10 + $0x58] sm:$0xff] }
 0x23d   : > { %1925 = vst [vmem:[%s3670_s28 + $0x28] sm:$0xff] %v1893_v37  ;;  %v1863_v55 = vmul.f32 0.33333334, %v1767_v48  ;;  %v1659_v18 = vpop.xlane.xlu1 %1658  ;;  %v1835_v43 = vmul.f32 0.33333334, %v1803_v49 }
 0x23e   : > { %1926 = vst [vmem:[%s3670_s28 + $0x30] sm:$0xff] %v1894_v53  ;;  %v2885_v32 = vpop.eup %2884  ;;  %v1864_v9 = vmul.f32 0.33333334, %v1768_v7  ;;  %2890 = vrsqrt.f32 %v1708_v14  ;;  %v1709_v62 = vmax.f32 %v1659_v18, 1e-24 }
 0x23f   : > { %v1895_v0 = vadd.f32 %v1863_v55, %v1831_v44  ;;  %v1769_v12 = vmul.f32 %v2885_v32, %v3500_v51  ;;  %v1836_v48 = vmul.f32 0.33333334, %v1804_v40  ;;  %v1810_v40 = vld [vmem:[%s3381_s10 + $0x90] sm:$0xff] }
 0x240   : > { %v1896_v16 = vadd.f32 %v1864_v9, %v1832_v5  ;;  %v2887_v24 = vpop.eup %2886  ;;  %2892 = vrsqrt.f32 %v1709_v62  ;;  %v1838_v9 = vmul.f32 0.33333334, %v1806_v30 }
 0x241   : > { %1927 = vst [vmem:[%s3670_s28 + $0x38] sm:$0xff] %v1895_v0  ;;  %v1865_v17 = vmul.f32 0.33333334, %v1769_v12  ;;  %v1770_v29 = vmul.f32 %v2887_v24, %v3509_v4  ;;  %v1805_v4 = vld [vmem:[%s3381_s10 + $0x68] sm:$0xff] }
 0x242   : > { %1928 = vst [vmem:[%s3670_s28 + $0x40] sm:$0xff] %v1896_v16  ;;  %v2889_v51 = vpop.eup %2888  ;;  %v1837_v53 = vmul.f32 0.33333334, %v1805_v4  ;;  %v1842_v4 = vmul.f32 0.33333334, %v1810_v40 }
 0x243   : > { %v1897_v20 = vadd.f32 %v1865_v17, %v1833_v11  ;;  %v1866_v31 = vmul.f32 0.33333334, %v1770_v29  ;;  %v1771_v34 = vmul.f32 %v2889_v51, %v3511_v6  ;;  %v1661_v36 = vpop.xlane.xlu0 %1660 }
 0x244   : > { %v1710_v37 = vmax.f32 %v1661_v36, 1e-24 }
 0x245   : > { %1929 = vst [vmem:[%s3670_s28 + $0x48] sm:$0xff] %v1897_v20  ;;  %v1898_v13 = vadd.f32 %v1866_v31, %v1834_v28  ;;  %v1867_v38 = vmul.f32 0.33333334, %v1771_v34  ;;  %v1663_v39 = vpop.xlane.xlu1 %1662  ;;  %v1808_v20 = vld [vmem:[%s3381_s10 + $0x80] sm:$0xff] }
 0x246   : > { %2894 = vrsqrt.f32 %v1710_v37  ;;  %v1711_v15 = vmax.f32 %v1663_v39, 1e-24  ;;  %v1840_v29 = vmul.f32 0.33333334, %v1808_v20 }
 0x247   : > { %1930 = vst [vmem:[%s3670_s28 + $0x50] sm:$0xff] %v1898_v13  ;;  %v1899_v41 = vadd.f32 %v1867_v38, %v1835_v43 }
 0x248   : > { %v2891_v44 = vpop.eup %2890  ;;  %2896 = vrsqrt.f32 %v1711_v15 }
 0x249   : > { %1931 = vst [vmem:[%s3670_s28 + $0x58] sm:$0xff] %v1899_v41  ;;  %v1772_v52 = vmul.f32 %v2891_v44, %v3520_v23  ;;  %v1807_v23 = vld [vmem:[%s3381_s10 + $0x78] sm:$0xff] }
 0x24a   : > { %v2893_v6 = vpop.eup %2892  ;;  %v1839_v60 = vmul.f32 0.33333334, %v1807_v23 }
 0x24b   : > { %v1868_v45 = vmul.f32 0.33333334, %v1772_v52  ;;  %v1773_v55 = vmul.f32 %v2893_v6, %v3522_v25  ;;  %v1665_v57 = vpop.xlane.xlu0 %1664 }
 0x24c   : > { %v1712_v59 = vmax.f32 %v1665_v57, 1e-24 }
 0x24d   : > { %v1900_v63 = vadd.f32 %v1868_v45, %v1836_v48  ;;  %v1869_v0 = vmul.f32 0.33333334, %v1773_v55  ;;  %v1667_v2 = vpop.xlane.xlu1 %1666 }
 0x24e   : > { %2898 = vrsqrt.f32 %v1712_v59  ;;  %v1713_v5 = vmax.f32 %v1667_v2, 1e-24 }
 0x24f   : > { %1932 = vst [vmem:[%s3670_s28 + $0x60] sm:$0xff] %v1900_v63  ;;  %v1901_v7 = vadd.f32 %v1869_v0, %v1837_v53  ;;  %v1812_v0 = vld [vmem:[%s3381_s10 + $0xa0] sm:$0xff] }
 0x250   : > { %v2895_v32 = vpop.eup %2894  ;;  %2900 = vrsqrt.f32 %v1713_v5 }
 0x251   : > { %1933 = vst [vmem:[%s3670_s28 + $0x68] sm:$0xff] %v1901_v7  ;;  %v1774_v11 = vmul.f32 %v2895_v32, %v3531_v42  ;;  %v1809_v42 = vld [vmem:[%s3381_s10 + $0x88] sm:$0xff]  ;;  %v1844_v7 = vmul.f32 0.33333334, %v1812_v0 }
 0x252   : > { %v2897_v25 = vpop.eup %2896  ;;  %v1841_v43 = vmul.f32 0.33333334, %v1809_v42 }
 0x253   : > { %v1870_v12 = vmul.f32 0.33333334, %v1774_v11  ;;  %v1775_v14 = vmul.f32 %v2897_v25, %v3533_v46  ;;  %v1669_v16 = vpop.xlane.xlu0 %1668 }
 0x254   : > { %v1714_v17 = vmax.f32 %v1669_v16, 1e-24 }
 0x255   : > { %v1902_v18 = vadd.f32 %v1870_v12, %v1838_v9  ;;  %v1871_v19 = vmul.f32 0.33333334, %v1775_v14  ;;  %v1671_v62 = vpop.xlane.xlu1 %1670 }
 0x256   : > { %2902 = vrsqrt.f32 %v1714_v17  ;;  %v1715_v24 = vmax.f32 %v1671_v62, 1e-24  ;;  %v1814_v17 = vld [vmem:[%s3381_s10 + $0xb0] sm:$0xff] }
 0x257   : > { %1934 = vst [vmem:[%s3670_s28 + $0x70] sm:$0xff] %v1902_v18  ;;  %v1903_v49 = vadd.f32 %v1871_v19, %v1839_v60  ;;  %v1846_v20 = vmul.f32 0.33333334, %v1814_v17 }
 0x258   : > { %v2899_v28 = vpop.eup %2898  ;;  %2904 = vrsqrt.f32 %v1715_v24 }
 0x259   : > { %1935 = vst [vmem:[%s3670_s28 + $0x78] sm:$0xff] %v1903_v49  ;;  %v1776_v51 = vmul.f32 %v2899_v28, %v3542_v1  ;;  %v1811_v1 = vld [vmem:[%s3381_s10 + $0x98] sm:$0xff] }
 0x25a   : > { %v2901_v46 = vpop.eup %2900  ;;  %v1843_v6 = vmul.f32 0.33333334, %v1811_v1 }
 0x25b   : > { %v1872_v31 = vmul.f32 0.33333334, %v1776_v51  ;;  %v1777_v34 = vmul.f32 %v2901_v46, %v3544_v3  ;;  %v1673_v36 = vpop.xlane.xlu0 %1672 }
 0x25c   : > { %v1716_v37 = vmax.f32 %v1673_v36, 1e-24 }
 0x25d   : > { %v1904_v13 = vadd.f32 %v1872_v31, %v1840_v29  ;;  %v1873_v38 = vmul.f32 0.33333334, %v1777_v34  ;;  %v1675_v39 = vpop.xlane.xlu1 %1674  ;;  %v1816_v34 = vld [vmem:[%s3381_s10 + $0xc0] sm:$0xff] }
 0x25e   : > { %2906 = vrsqrt.f32 %v1716_v37  ;;  %v1717_v15 = vmax.f32 %v1675_v39, 1e-24 }
 0x25f   : > { %1936 = vst [vmem:[%s3670_s28 + $0x80] sm:$0xff] %v1904_v13  ;;  %v1905_v41 = vadd.f32 %v1873_v38, %v1841_v43  ;;  %v1848_v38 = vmul.f32 0.33333334, %v1816_v34 }
 0x260   : > { %v2903_v44 = vpop.eup %2902  ;;  %2908 = vrsqrt.f32 %v1717_v15 }
 0x261   : > { %1937 = vst [vmem:[%s3670_s28 + $0x88] sm:$0xff] %v1905_v41  ;;  %v1778_v48 = vmul.f32 %v2903_v44, %v3553_v22  ;;  %v1813_v22 = vld [vmem:[%s3381_s10 + $0xa8] sm:$0xff] }
 0x262   : > { %v2905_v3 = vpop.eup %2904  ;;  %v1845_v9 = vmul.f32 0.33333334, %v1813_v22 }
 0x263   : > { %v1874_v52 = vmul.f32 0.33333334, %v1778_v48  ;;  %v1779_v45 = vmul.f32 %v2905_v3, %v3555_v26  ;;  %v1677_v53 = vpop.xlane.xlu0 %1676 }
 0x264   : > { %v1718_v55 = vmax.f32 %v1677_v53, 1e-24 }
 0x265   : > { %v1906_v57 = vadd.f32 %v1874_v52, %v1842_v4  ;;  %v1875_v59 = vmul.f32 0.33333334, %v1779_v45  ;;  %v1679_v63 = vpop.xlane.xlu1 %1678  ;;  %v1818_v52 = vld [vmem:[%s3381_s10 + $0xd0] sm:$0xff] }
 0x266   : > { %2910 = vrsqrt.f32 %v1718_v55  ;;  %v1719_v2 = vmax.f32 %v1679_v63, 1e-24  ;;  %v1850_v55 = vmul.f32 0.33333334, %v1818_v52 }
 0x267   : > { %1938 = vst [vmem:[%s3670_s28 + $0x90] sm:$0xff] %v1906_v57  ;;  %v1907_v30 = vadd.f32 %v1875_v59, %v1843_v6 }
 0x268   : > { %v2907_v5 = vpop.eup %2906  ;;  %2912 = vrsqrt.f32 %v1719_v2 }
 0x269   : > { %1939 = vst [vmem:[%s3670_s28 + $0x98] sm:$0xff] %v1907_v30  ;;  %v1780_v32 = vmul.f32 %v2907_v5, %v3564_v47  ;;  %v1815_v47 = vld [vmem:[%s3381_s10 + $0xb8] sm:$0xff] }
 0x26a   : > { %v2909_v26 = vpop.eup %2908  ;;  %v1847_v28 = vmul.f32 0.33333334, %v1815_v47  ;;  %v1823_v47 = vld [vmem:[%s3381_s10 + $0xf8] sm:$0xff] }
 0x26b   : > { %v1876_v23 = vmul.f32 0.33333334, %v1780_v32  ;;  %v1781_v11 = vmul.f32 %v2909_v26, %v3566_v50  ;;  %v1681_v25 = vpop.xlane.xlu0 %1680  ;;  %v1820_v32 = vld [vmem:[%s3381_s10 + $0xe0] sm:$0xff] }
 0x26c   : > { %v1720_v12 = vmax.f32 %v1681_v25, 1e-24 }
 0x26d   : > { %v1908_v60 = vadd.f32 %v1876_v23, %v1844_v7  ;;  %v1877_v14 = vmul.f32 0.33333334, %v1781_v11  ;;  %v1683_v16 = vpop.xlane.xlu1 %1682  ;;  %v1852_v11 = vmul.f32 0.33333334, %v1820_v32 }
 0x26e   : > { %2914 = vrsqrt.f32 %v1720_v12  ;;  %v1721_v18 = vmax.f32 %v1683_v16, 1e-24 }
 0x26f   : > { %1940 = vst [vmem:[%s3670_s28 + $0xa0] sm:$0xff] %v1908_v60  ;;  %v1909_v19 = vadd.f32 %v1877_v14, %v1845_v9  ;;  %v1821_v9 = vld [vmem:[%s3381_s10 + $0xe8] sm:$0xff] }
 0x270   : > { %v2911_v62 = vpop.eup %2910  ;;  %2916 = vrsqrt.f32 %v1721_v18  ;;  %v1853_v60 = vmul.f32 0.33333334, %v1821_v9  ;;  %v1822_v18 = vld [vmem:[%s3381_s10 + $0xf0] sm:$0xff] }
 0x271   : > { %1941 = vst [vmem:[%s3670_s28 + $0xa8] sm:$0xff] %v1909_v19  ;;  %v1782_v24 = vmul.f32 %v2911_v62, %v3575_v8  ;;  %v1817_v8 = vld [vmem:[%s3381_s10 + $0xc8] sm:$0xff] }
 0x272   : > { %v2913_v50 = vpop.eup %2912  ;;  %v1849_v15 = vmul.f32 0.33333334, %v1817_v8 }
 0x273   : > { %v1878_v49 = vmul.f32 0.33333334, %v1782_v24  ;;  %v1783_v42 = vmul.f32 %v2913_v50, %v3577_v10  ;;  %v1685_v29 = vpop.xlane.xlu0 %1684 }
 0x274   : > { %v1722_v51 = vmax.f32 %v1685_v29, 1e-24 }
 0x275   : > { %v1910_v46 = vadd.f32 %v1878_v49, %v1846_v20  ;;  %v1879_v31 = vmul.f32 0.33333334, %v1783_v42  ;;  %v1687_v43 = vpop.xlane.xlu1 %1686  ;;  %v1854_v20 = vmul.f32 0.33333334, %v1822_v18  ;;  %v1855_v49 = vmul.f32 0.33333334, %v1823_v47 }
 0x276   : > { %2918 = vrsqrt.f32 %v1722_v51  ;;  %v1723_v36 = vmax.f32 %v1687_v43, 1e-24 }
 0x277   : > { %1942 = vst [vmem:[%s3670_s28 + $0xb0] sm:$0xff] %v1910_v46  ;;  %v1911_v37 = vadd.f32 %v1879_v31, %v1847_v28 }
 0x278   : > { %v2915_v13 = vpop.eup %2914  ;;  %2920 = vrsqrt.f32 %v1723_v36 }
 0x279   : > { %1943 = vst [vmem:[%s3670_s28 + $0xb8] sm:$0xff] %v1911_v37  ;;  %v1784_v39 = vmul.f32 %v2915_v13, %v3586_v33  ;;  %v1819_v33 = vld [vmem:[%s3381_s10 + $0xd8] sm:$0xff]  ;;  %s3766_s10 = scalar_lea.hbm %s3823_s4, %s2325_s6 }
 0x27a   : > { %v2917_v10 = vpop.eup %2916  ;;  %v1851_v63 = vmul.f32 0.33333334, %v1819_v33 }
 0x27b   : > { %v1880_v40 = vmul.f32 0.33333334, %v1784_v39  ;;  %v1785_v41 = vmul.f32 %v2917_v10, %v3588_v35  ;;  %v1689_v44 = vpop.xlane.xlu0 %1688 }
 0x27c   : > { %v1724_v1 = vmax.f32 %v1689_v44, 1e-24 }
 0x27d   : > { %v1912_v4 = vadd.f32 %v1880_v40, %v1848_v38  ;;  %v1881_v48 = vmul.f32 0.33333334, %v1785_v41  ;;  %v1691_v3 = vpop.xlane.xlu1 %1690 }
 0x27e   : > { %2922 = vrsqrt.f32 %v1724_v1  ;;  %v1725_v6 = vmax.f32 %v1691_v3, 1e-24 }
 0x27f   : > { %1944 = vst [vmem:[%s3670_s28 + $0xc0] sm:$0xff] %v1912_v4  ;;  %v1913_v45 = vadd.f32 %v1881_v48, %v1849_v15 }
 0x280   : > { %v2919_v53 = vpop.eup %2918  ;;  %2924 = vrsqrt.f32 %v1725_v6 }
 0x281   : > { %1945 = vst [vmem:[%s3670_s28 + $0xc8] sm:$0xff] %v1913_v45  ;;  %v1786_v57 = vmul.f32 %v2919_v53, %v3597_v58 }
 0x282   : > { %v2921_v35 = vpop.eup %2920 }
 0x283   : > { %v1882_v59 = vmul.f32 0.33333334, %v1786_v57  ;;  %v1787_v0 = vmul.f32 %v2921_v35, %v3599_v61  ;;  %v1693_v2 = vpop.xlane.xlu0 %1692 }
 0x284   : > { %v1726_v30 = vmax.f32 %v1693_v2, 1e-24 }
 0x285   : > { %v1914_v5 = vadd.f32 %v1882_v59, %v1850_v55  ;;  %v1883_v22 = vmul.f32 0.33333334, %v1787_v0  ;;  %v1695_v7 = vpop.xlane.xlu1 %1694 }
 0x286   : > { %2926 = vrsqrt.f32 %v1726_v30  ;;  %v1727_v26 = vmax.f32 %v1695_v7, 1e-24 }
 0x287   : > { %1946 = vst [vmem:[%s3670_s28 + $0xd0] sm:$0xff] %v1914_v5  ;;  %v1915_v23 = vadd.f32 %v1883_v22, %v1851_v63 }
 0x288   : > { %v2923_v58 = vpop.eup %2922  ;;  %2928 = vrsqrt.f32 %v1727_v26 }
 0x289   : > { %1947 = vst [vmem:[%s3670_s28 + $0xd8] sm:$0xff] %v1915_v23  ;;  %v1788_v61 = vmul.f32 %v2923_v58, %v3608_v21 }
 0x28a   : > { %v2925_v25 = vpop.eup %2924 }
 0x28b   : > { %v1884_v12 = vmul.f32 0.33333334, %v1788_v61  ;;  %v1789_v14 = vmul.f32 %v2925_v25, %v3610_v27 }
 0x28d   : > { %v1916_v16 = vadd.f32 %v1884_v12, %v1852_v11  ;;  %v1885_v17 = vmul.f32 0.33333334, %v1789_v14 }
 0x28f   : > { %1948 = vst [vmem:[%s3670_s28 + $0xe0] sm:$0xff] %v1916_v16  ;;  %v1917_v19 = vadd.f32 %v1885_v17, %v1853_v60 }
 0x290   : > { %v2927_v62 = vpop.eup %2926 }
 0x291   : > { %1949 = vst [vmem:[%s3670_s28 + $0xe8] sm:$0xff] %v1917_v19  ;;  %v1790_v21 = vmul.f32 %v2927_v62, %v3619_v54 }
 0x292   : > { %v2929_v24 = vpop.eup %2928 }
 0x293   : > { %v1886_v50 = vmul.f32 0.33333334, %v1790_v21  ;;  %v1791_v27 = vmul.f32 %v2929_v24, %v3621_v56 }
 0x295   : > { %v1918_v28 = vadd.f32 %v1886_v50, %v1854_v20  ;;  %v1887_v42 = vmul.f32 0.33333334, %v1791_v27 }
 0x297   : > { %1950 = vst [vmem:[%s3670_s28 + $0xf0] sm:$0xff] %v1918_v28  ;;  %v1919_v54 = vadd.f32 %v1887_v42, %v1855_v49 }
 0x299   : > { %1951 = vst [vmem:[%s3670_s28 + $0xf8] sm:$0xff] %v1919_v54 }
 0x29a   : > { %3059 = shalt.err (!%p3056_p8)
}
 0x29b   : > { %s3060_s11 = scalar_lea.hbm %s3766_s10, 4096  ;;  %s3064_s26 = scalar_lea.hbm %s3823_s4, 8192 }
 0x29c   : > { %p3061_p13 = scmp.ne.s32.totalorder %s3766_s10, %s3060_s11  ;;  %p3065_p4 = scmp.lt.u32.totalorder %s3766_s10, %s3823_s4 }
 0x29d   : > { %p3066_p0 = scmp.lt.u32.totalorder %s3064_s26, %s3060_s11  ;;  %p3068_p1 = scmp.lt.u32.totalorder %s3060_s11, %s3766_s10 }
 0x29e   : > { %p3062_p11 = pnand %p3061_p13, %p3850_p6 }
 0x29f   : > { %p3067_p12 = por %p3066_p0, %p3065_p4 }
 0x2a0   : > { %p3063_p2 = pneg %p3062_p11 }
 0x2a1   : > { %p3069_p9 = por %p3068_p1, %p3067_p12 }
 0x2a3   : > { %p3070_p3 = pnand %p3069_p9, %p3063_p2 }
 0x2a5   : > { %3073 = shalt.err (!%p3070_p3)
}
 0x2a6   : > { %s3155_s14 = smov 128   ;;  %s3156_s29 = smov 8  }
 0x2a7   : > { %2654 = dma.vmem_to_hbm [thread:$0]  (%p3850_p6), %s3768_s22, 4096, %s3766_s10, %s1958_s0, %s3155_s14, %s3155_s14, %s3156_s29  }
 0x2a8 PF: > { %s2002_s28 = sand.u32 1, %s3120_s15   ;;  %p3851_p5 = scmp.ne.s32.totalorder %s3840_s8, 0 }
 0x2a9   : > { %p3852_p7 = scmp.ge.s32.totalorder %s3140_s20, 2  ;;  %s2003_s6 = scalar_lea.sflag [#allocation5], %s2002_s28 }
 0x2ab   : > { %p2669_p10 = pnand %p3852_p7, %p3851_p5 }
 0x2ad   : > { %3111 = dma.done.wait (!%p2669_p10), %s2003_s6, 2048  }
 0x2ae   : > { %3113 = vsyncadd (!%p2669_p10), %s2003_s6, 4294965248  ;;  %s2012_s24 = scalar_lea.sflag [#allocation11], %s2002_s28 }
 0x2af   : > { %3115 = dma.done.wait (!%p2669_p10), %s2012_s24, 4096  }
 0x2b0   : > { %3117 = vsyncadd (!%p2669_p10), %s2012_s24, 4294963200  ;;  %s25_s20 = sadd.s32 1, %s3140_s20   ;;  %s3853_s18 = sld [smem:[#allocation17_spill]] }
 0x2b1   : > { %p22_p8 = scmp.ge.s32.totalorder %s25_s20, 4   ;;  %s3854_s19 = sld [smem:[#allocation18_spill]] }
 0x2b2   : > { %s3855_s15 = smov %s3124_s16  ;;  %s3856_s16 = smov %s3128_s17 }
 0x2b3   : > { %s3857_s17 = smov %s3230_s27  ;;  %24 = sbr.rel (!%p22_p8) target bundleno = 11 (0xb), region = 118 }
 0x2ba   :  { %2017 = vsyncpa [#allocation4], 1 }
 0x2bb   :  { %2019 = vsyncpa [#allocation4 + $0x1], 1 }
 0x2bc   :  { %2020 = vsyncpa [#allocation7], 1 }
 0x2bd   :  { %2021 = vsyncpa [#allocation5], 1 }
 0x2be   :  { %2023 = vsyncpa [#allocation5 + $0x1], 1 }
 0x2bf   :  { %2024 = vsyncpa [#allocation11], 1 }
 0x2c0   :  { %2026 = vsyncpa [#allocation11 + $0x1], 1 }

</bundles_post_ra>
